<compile_context>
chip_gen: v5e
topology: v5e:2x2
jax: 0.10.0
libtpu: 0.0.40
codegen_flags: <defaults>
</compile_context>

<pallas_src>
import jax
import jax.numpy as jnp
from jax.experimental import pallas as pl
from jax.experimental.pallas import tpu as pltpu  # noqa: F401  (kept for TPU backend import)

# ----------------------- small deterministic config -----------------------
SEQ = 8
HIDDEN = 128
NUM_HEADS = 4
NUM_KV_HEADS = 2
HEAD_DIM = HIDDEN // NUM_HEADS          # 32
Q_SIZE = NUM_HEADS * HEAD_DIM           # 128
KV_SIZE = NUM_KV_HEADS * HEAD_DIM       # 64
INTERMEDIATE = 256
ROPE_THETA = 1_000_000.0

INIT_RANGE = 0.02                        # config.initializer_range
SQK_INIT_VALUE = 1.0
SUV_INIT_VALUE = 1.0
SUV_INIT_SCALING = 1.0
ATTN_ALPHA_INIT_VALUE = 0.05
MLP_ALPHA_INIT_VALUE = 0.05

NEG_INF = -1e30
DTYPE = jnp.float32


def _full_spec(shape):
    """BlockSpec covering the full array (single kernel invocation, no grid)."""
    return pl.BlockSpec(shape, lambda *_: (0,) * len(shape))


# ------------------------- fused single-layer kernel -------------------------
def _fused_layer_kernel(x_ref, cos_ref, sin_ref,
                        w_qkv_ref, w_o_ref, w_up_ref, w_down_ref,
                        sqk2_ref, suv_ref, attn_lr_ref, mlp_lr_ref,
                        o_ref):
    f32 = jnp.float32
    x = x_ref[...]                       # (T, HIDDEN) lane-dense
    cos = cos_ref[...]                   # (T, HEAD_DIM)
    sin = sin_ref[...]                   # (T, HEAD_DIM)
    sqk2 = sqk2_ref[...]                 # (1, Q_SIZE)  (already squared & scaled)

    def unit(z):
        # Row-wise L2 normalization, eps=0 as in the module's normalize_vector.
        return z * jax.lax.rsqrt(jnp.sum(z * z, axis=-1, keepdims=True))

    half = HEAD_DIM // 2

    def rope(z):                         # neox rotate-half on one head (T, HEAD_DIM)
        z1 = z[:, :half]
        z2 = z[:, half:]
        return z * cos + jnp.concatenate([-z2, z1], axis=-1) * sin

    # ---------------- qkv projection (one MXU matmul) ----------------
    qkv = jnp.dot(x, w_qkv_ref[...], preferred_element_type=f32)   # (T, Q+2KV)

    group = NUM_HEADS // NUM_KV_HEADS

    # KV heads: rope + L2 norm computed once per kv head (shared by the group).
    ks, vs = [], []
    for j in range(NUM_KV_HEADS):
        k_h = qkv[:, Q_SIZE + j * HEAD_DIM: Q_SIZE + (j + 1) * HEAD_DIM]
        v_h = qkv[:, Q_SIZE + KV_SIZE + j * HEAD_DIM: Q_SIZE + KV_SIZE + (j + 1) * HEAD_DIM]
        ks.append(unit(rope(k_h)))
        vs.append(v_h)

    t = x.shape[0]
    row = jax.lax.broadcasted_iota(jnp.int32, (t, t), 0)
    col = jax.lax.broadcasted_iota(jnp.int32, (t, t), 1)
    causal = col <= row

    # NOTE: nGPT scales logits by sqrt(head_dim) (Attention(..., scale=head_dim**0.5)).
    scale = HEAD_DIM ** 0.5

    # Unrolled per-head attention inside the single fused kernel (no grid steps).
    outs = []
    for h in range(NUM_HEADS):
        q_h = qkv[:, h * HEAD_DIM: (h + 1) * HEAD_DIM]
        q_h = unit(rope(q_h)) * sqk2[:, h * HEAD_DIM: (h + 1) * HEAD_DIM]
        k_h = ks[h // group]
        v_h = vs[h // group]

        s = jax.lax.dot_general(q_h, k_h, (((1,), (1,)), ((), ())),
                                preferred_element_type=f32) * scale   # (T, T)
        s = jnp.where(causal, s, NEG_INF)
        s = s - jnp.max(s, axis=-1, keepdims=True)
        p = jnp.exp(s)
        p = p * pl.reciprocal(jnp.sum(p, axis=-1, keepdims=True), approx=True)
        outs.append(jnp.dot(p, v_h, preferred_element_type=f32))      # (T, HEAD_DIM)

    attn = jnp.concatenate(outs, axis=-1)                              # (T, Q_SIZE) lane-dense

    attn_out = jnp.dot(attn, w_o_ref[...], preferred_element_type=f32)  # (T, HIDDEN)

    def residual_update(h_new, res, lr):
        a = unit(res)
        b = unit(h_new)
        return unit(a + lr * (b - a))

    h1 = residual_update(attn_out, x, attn_lr_ref[...])

    # ---------------- MLP ----------------
    up = jnp.dot(h1, w_up_ref[...], preferred_element_type=f32)       # (T, INTERMEDIATE)
    g = suv_ref[...] * up
    act = g * jax.nn.sigmoid(g)                                        # silu
    mlp_out = jnp.dot(act, w_down_ref[...], preferred_element_type=f32)

    o_ref[...] = residual_update(mlp_out, h1, mlp_lr_ref[...]).astype(o_ref.dtype)


# ------------------------------ layer forward ------------------------------
def _rope_tables(positions):
    half = HEAD_DIM // 2
    inv_freq = 1.0 / (ROPE_THETA ** (jnp.arange(0, half, dtype=jnp.float32) * 2.0 / HEAD_DIM))
    freqs = positions.astype(jnp.float32)[:, None] * inv_freq[None, :]   # (T, half)
    cos = jnp.concatenate([jnp.cos(freqs)] * 2, axis=-1)                  # (T, HEAD_DIM)
    sin = jnp.concatenate([jnp.sin(freqs)] * 2, axis=-1)
    return cos, sin


def prepare_params(raw):
    """Fold all constant scalings into the parameters ONCE (outside per-token path)."""
    return {
        "w_qkv": raw["w_qkv"],
        "w_o": raw["w_o"],
        "w_up": raw["w_up"],
        "w_down": raw["w_down"],
        "sqk2": ((raw["sqk_w"] * (SQK_INIT_VALUE / INIT_RANGE)) ** 2).reshape(1, Q_SIZE),
        "suv": (raw["suv_w"] * (SUV_INIT_VALUE / SUV_INIT_SCALING * HIDDEN ** 0.5)
                ).reshape(1, INTERMEDIATE),
        "attn_lr": jnp.abs(raw["attn_alpha"] * (ATTN_ALPHA_INIT_VALUE / INIT_RANGE)
                           ).reshape(1, HIDDEN),
        "mlp_lr": jnp.abs(raw["mlp_alpha"] * (MLP_ALPHA_INIT_VALUE / INIT_RANGE)
                          ).reshape(1, HIDDEN),
    }


def ngpt_decoder_layer(positions, hidden_states, eff):
    t, hid = hidden_states.shape
    cos, sin = _rope_tables(positions)                                   # tiny, done in XLA

    return pl.pallas_call(
        _fused_layer_kernel,
        out_shape=jax.ShapeDtypeStruct((t, hid), hidden_states.dtype),
        in_specs=[
            _full_spec((t, hid)),                       # hidden_states
            _full_spec((t, HEAD_DIM)),                  # cos
            _full_spec((t, HEAD_DIM)),                  # sin
            _full_spec((hid, Q_SIZE + 2 * KV_SIZE)),    # w_qkv
            _full_spec((Q_SIZE, hid)),                  # w_o
            _full_spec((hid, INTERMEDIATE)),            # w_up
            _full_spec((INTERMEDIATE, hid)),            # w_down
            _full_spec((1, Q_SIZE)),                    # sqk**2 (pre-scaled)
            _full_spec((1, INTERMEDIATE)),              # suv (pre-scaled)
            _full_spec((1, hid)),                       # attn lr = |alpha*scale|
            _full_spec((1, hid)),                       # mlp  lr = |alpha*scale|
        ],
        out_specs=_full_spec((t, hid)),
    )(hidden_states, cos, sin,
      eff["w_qkv"], eff["w_o"], eff["w_up"], eff["w_down"],
      eff["sqk2"], eff["suv"], eff["attn_lr"], eff["mlp_lr"])


# --------------------------- pure-JAX reference ----------------------------
def reference_forward(positions, x, p):
    def norm(v):
        return v / jnp.linalg.norm(v, axis=-1, keepdims=True)

    t = x.shape[0]
    qkv = x @ p["w_qkv"]
    q, k, v = jnp.split(qkv, [Q_SIZE, Q_SIZE + KV_SIZE], axis=-1)
    q = q.reshape(t, NUM_HEADS, HEAD_DIM)
    k = k.reshape(t, NUM_KV_HEADS, HEAD_DIM)
    v = v.reshape(t, NUM_KV_HEADS, HEAD_DIM)

    cos, sin = _rope_tables(positions)
    cos = cos[:, None, :]
    sin = sin[:, None, :]
    half = HEAD_DIM // 2

    def rope(x3):
        x1, x2 = x3[..., :half], x3[..., half:]
        return x3 * cos + jnp.concatenate([-x2, x1], axis=-1) * sin

    q = rope(q)
    k = rope(k)
    sqk = (p["sqk_w"] * (SQK_INIT_VALUE / INIT_RANGE)).reshape(NUM_HEADS, HEAD_DIM)
    q = norm(q) * (sqk ** 2)[None]
    k = norm(k)

    group = NUM_HEADS // NUM_KV_HEADS
    kr = jnp.repeat(k, group, axis=1)
    vr = jnp.repeat(v, group, axis=1)
    s = jnp.einsum("thd,shd->hts", q, kr) * (HEAD_DIM ** 0.5)
    row = jnp.arange(t)[:, None]
    col = jnp.arange(t)[None, :]
    s = jnp.where(col <= row, s, NEG_INF)
    pa = jax.nn.softmax(s, axis=-1)
    o = jnp.einsum("hts,shd->thd", pa, vr).reshape(t, Q_SIZE)
    attn_out = o @ p["w_o"]

    def res_update(h, r, alpha, init_val):
        lr = jnp.abs(alpha * (init_val / INIT_RANGE))
        return norm(norm(r) + lr * (norm(h) - norm(r)))

    h1 = res_update(attn_out, x, p["attn_alpha"], ATTN_ALPHA_INIT_VALUE)

    suv = p["suv_w"] * (SUV_INIT_VALUE / SUV_INIT_SCALING * HIDDEN ** 0.5)
    up = h1 @ p["w_up"]
    g = suv[None, :] * up
    act = g * jax.nn.sigmoid(g)
    mlp_out = act @ p["w_down"]
    return res_update(mlp_out, h1, p["mlp_alpha"], MLP_ALPHA_INIT_VALUE)


# ---------------------------------- main -----------------------------------
if __name__ == "__main__":
    key = jax.random.PRNGKey(0)
    k1, k2, k3, k4, k5 = jax.random.split(key, 5)
    w_scale = 0.02

    raw_params = {
        # projection weights stored (in, out); PyTorch nn.Linear does x @ W.T,
        # here we store W already transposed so the kernel does x @ W.
        "w_qkv": w_scale * jax.random.normal(k1, (HIDDEN, Q_SIZE + 2 * KV_SIZE), DTYPE),
        "w_o": w_scale * jax.random.normal(k2, (Q_SIZE, HIDDEN), DTYPE),
        "w_up": w_scale * jax.random.normal(k3, (HIDDEN, INTERMEDIATE), DTYPE),
        "w_down": w_scale * jax.random.normal(k4, (INTERMEDIATE, HIDDEN), DTYPE),
        # module __init__ uses constant inits for these
        "sqk_w": jnp.full((Q_SIZE,), INIT_RANGE, DTYPE),
        "suv_w": jnp.full((INTERMEDIATE,), SUV_INIT_SCALING, DTYPE),
        "attn_alpha": jnp.full((HIDDEN,), INIT_RANGE, DTYPE),
        "mlp_alpha": jnp.full((HIDDEN,), INIT_RANGE, DTYPE),
    }

    positions = jnp.arange(SEQ, dtype=jnp.int32)
    hidden_states = jax.random.normal(k5, (SEQ, HIDDEN), DTYPE)
    # nGPT keeps hidden states on the unit hypersphere
    hidden_states = hidden_states / jnp.linalg.norm(hidden_states, axis=-1, keepdims=True)

    eff_params = prepare_params(raw_params)   # constant folding done once, outside jit

    fwd = jax.jit(ngpt_decoder_layer)
    out = fwd(positions, hidden_states, eff_params)
    jax.block_until_ready(out)

    ref = reference_forward(positions, hidden_states, raw_params)
    err = float(jnp.max(jnp.abs(out - ref)))
    assert err < 1e-3, f"max abs error vs reference: {err}"

    print("KERNEL_OK")
</pallas_src>

<mosaic_0001>
module attributes {stable_mosaic.version = 11 : i64} {
  func.func @_fused_layer_kernel(%arg0: memref<8x128xf32, #tpu.memory_space<vmem>>, %arg1: memref<8x32xf32, #tpu.memory_space<vmem>>, %arg2: memref<8x32xf32, #tpu.memory_space<vmem>>, %arg3: memref<128x256xf32, #tpu.memory_space<vmem>>, %arg4: memref<128x128xf32, #tpu.memory_space<vmem>>, %arg5: memref<128x256xf32, #tpu.memory_space<vmem>>, %arg6: memref<256x128xf32, #tpu.memory_space<vmem>>, %arg7: memref<1x128xf32, #tpu.memory_space<vmem>>, %arg8: memref<1x256xf32, #tpu.memory_space<vmem>>, %arg9: memref<1x128xf32, #tpu.memory_space<vmem>>, %arg10: memref<1x128xf32, #tpu.memory_space<vmem>>, %arg11: memref<8x128xf32, #tpu.memory_space<vmem>>) attributes {dimension_semantics = [], scalar_prefetch = 0 : i64, scratch_operands = 0 : i64, tpu.core_type = #tpu.core_type<tc>} {
    %c0 = arith.constant 0 : index
    %c0_0 = arith.constant 0 : index
    %0 = vector.load %arg0[%c0, %c0_0] : memref<8x128xf32, #tpu.memory_space<vmem>>, vector<8x128xf32>
    %c0_1 = arith.constant 0 : index
    %c0_2 = arith.constant 0 : index
    %1 = vector.load %arg1[%c0_1, %c0_2] : memref<8x32xf32, #tpu.memory_space<vmem>>, vector<8x32xf32>
    %c0_3 = arith.constant 0 : index
    %c0_4 = arith.constant 0 : index
    %2 = vector.load %arg2[%c0_3, %c0_4] : memref<8x32xf32, #tpu.memory_space<vmem>>, vector<8x32xf32>
    %c0_5 = arith.constant 0 : index
    %c0_6 = arith.constant 0 : index
    %3 = vector.load %arg7[%c0_5, %c0_6] : memref<1x128xf32, #tpu.memory_space<vmem>>, vector<1x128xf32>
    %c0_7 = arith.constant 0 : index
    %c0_8 = arith.constant 0 : index
    %4 = vector.load %arg3[%c0_7, %c0_8] : memref<128x256xf32, #tpu.memory_space<vmem>>, vector<128x256xf32>
    %cst = arith.constant dense<0.000000e+00> : vector<8x256xf32>
    %5 = tpu.matmul %0, %4, %cst {dimension_numbers = #tpu.dot_dimension_numbers<[1], [0], [0], [1], [0, 0, 1, 1], [], []>} : vector<8x128xf32>, vector<128x256xf32>, vector<8x256xf32> -> vector<8x256xf32>
    %6 = vector.extract_strided_slice %5 {offsets = [0, 128], sizes = [8, 32], strides = [1, 1]} : vector<8x256xf32> to vector<8x32xf32>
    %7 = vector.extract_strided_slice %5 {offsets = [0, 192], sizes = [8, 32], strides = [1, 1]} : vector<8x256xf32> to vector<8x32xf32>
    %8 = vector.extract_strided_slice %6 {offsets = [0, 0], sizes = [8, 16], strides = [1, 1]} : vector<8x32xf32> to vector<8x16xf32>
    %9 = vector.extract_strided_slice %6 {offsets = [0, 16], sizes = [8, 16], strides = [1, 1]} : vector<8x32xf32> to vector<8x16xf32>
    %10 = arith.mulf %6, %1 : vector<8x32xf32>
    %cst_9 = arith.constant 0.000000e+00 : f32
    %11 = vector.broadcast %cst_9 : f32 to vector<8x16xf32>
    %12 = arith.subf %11, %9 : vector<8x16xf32>
    %13 = tpu.concatenate %12, %8 in 1 : vector<8x16xf32>, vector<8x16xf32> -> vector<8x32xf32>
    %14 = arith.mulf %13, %2 : vector<8x32xf32>
    %15 = arith.addf %10, %14 : vector<8x32xf32>
    %16 = arith.mulf %15, %15 : vector<8x32xf32>
    %cst_10 = arith.constant dense<0.000000e+00> : vector<8xf32>
    %17 = vector.multi_reduction <add>, %16, %cst_10 [1] : vector<8x32xf32> to vector<8xf32>
    %18 = vector.shape_cast %17 : vector<8xf32> to vector<8x1xf32>
    %19 = math.rsqrt %18 : vector<8x1xf32>
    %20 = vector.broadcast %19 : vector<8x1xf32> to vector<8x32xf32>
    %21 = arith.mulf %15, %20 : vector<8x32xf32>
    %22 = vector.extract_strided_slice %5 {offsets = [0, 160], sizes = [8, 32], strides = [1, 1]} : vector<8x256xf32> to vector<8x32xf32>
    %23 = vector.extract_strided_slice %5 {offsets = [0, 224], sizes = [8, 32], strides = [1, 1]} : vector<8x256xf32> to vector<8x32xf32>
    %24 = vector.extract_strided_slice %22 {offsets = [0, 0], sizes = [8, 16], strides = [1, 1]} : vector<8x32xf32> to vector<8x16xf32>
    %25 = vector.extract_strided_slice %22 {offsets = [0, 16], sizes = [8, 16], strides = [1, 1]} : vector<8x32xf32> to vector<8x16xf32>
    %26 = arith.mulf %22, %1 : vector<8x32xf32>
    %cst_11 = arith.constant 0.000000e+00 : f32
    %27 = vector.broadcast %cst_11 : f32 to vector<8x16xf32>
    %28 = arith.subf %27, %25 : vector<8x16xf32>
    %29 = tpu.concatenate %28, %24 in 1 : vector<8x16xf32>, vector<8x16xf32> -> vector<8x32xf32>
    %30 = arith.mulf %29, %2 : vector<8x32xf32>
    %31 = arith.addf %26, %30 : vector<8x32xf32>
    %32 = arith.mulf %31, %31 : vector<8x32xf32>
    %cst_12 = arith.constant dense<0.000000e+00> : vector<8xf32>
    %33 = vector.multi_reduction <add>, %32, %cst_12 [1] : vector<8x32xf32> to vector<8xf32>
    %34 = vector.shape_cast %33 : vector<8xf32> to vector<8x1xf32>
    %35 = math.rsqrt %34 : vector<8x1xf32>
    %36 = vector.broadcast %35 : vector<8x1xf32> to vector<8x32xf32>
    %37 = arith.mulf %31, %36 : vector<8x32xf32>
    %38 = tpu.iota {dimensions = array<i32: 0>} : vector<8x8xi32>
    %39 = tpu.iota {dimensions = array<i32: 1>} : vector<8x8xi32>
    %40 = arith.cmpi sle, %39, %38 : vector<8x8xi32>
    %41 = vector.extract_strided_slice %5 {offsets = [0, 0], sizes = [8, 32], strides = [1, 1]} : vector<8x256xf32> to vector<8x32xf32>
    %42 = vector.extract_strided_slice %41 {offsets = [0, 0], sizes = [8, 16], strides = [1, 1]} : vector<8x32xf32> to vector<8x16xf32>
    %43 = vector.extract_strided_slice %41 {offsets = [0, 16], sizes = [8, 16], strides = [1, 1]} : vector<8x32xf32> to vector<8x16xf32>
    %44 = arith.mulf %41, %1 : vector<8x32xf32>
    %cst_13 = arith.constant 0.000000e+00 : f32
    %45 = vector.broadcast %cst_13 : f32 to vector<8x16xf32>
    %46 = arith.subf %45, %43 : vector<8x16xf32>
    %47 = tpu.concatenate %46, %42 in 1 : vector<8x16xf32>, vector<8x16xf32> -> vector<8x32xf32>
    %48 = arith.mulf %47, %2 : vector<8x32xf32>
    %49 = arith.addf %44, %48 : vector<8x32xf32>
    %50 = arith.mulf %49, %49 : vector<8x32xf32>
    %cst_14 = arith.constant dense<0.000000e+00> : vector<8xf32>
    %51 = vector.multi_reduction <add>, %50, %cst_14 [1] : vector<8x32xf32> to vector<8xf32>
    %52 = vector.shape_cast %51 : vector<8xf32> to vector<8x1xf32>
    %53 = math.rsqrt %52 : vector<8x1xf32>
    %54 = vector.broadcast %53 : vector<8x1xf32> to vector<8x32xf32>
    %55 = arith.mulf %49, %54 : vector<8x32xf32>
    %56 = vector.extract_strided_slice %3 {offsets = [0, 0], sizes = [1, 32], strides = [1, 1]} : vector<1x128xf32> to vector<1x32xf32>
    %57 = vector.broadcast %56 : vector<1x32xf32> to vector<8x32xf32>
    %58 = arith.mulf %55, %57 : vector<8x32xf32>
    %cst_15 = arith.constant dense<0.000000e+00> : vector<8x8xf32>
    %59 = tpu.matmul %58, %21, %cst_15 {dimension_numbers = #tpu.dot_dimension_numbers<[1], [1], [0], [0], [0, 0, 1, 0], [], []>} : vector<8x32xf32>, vector<8x32xf32>, vector<8x8xf32> -> vector<8x8xf32>
    %cst_16 = arith.constant 5.65685415 : f32
    %60 = vector.broadcast %cst_16 : f32 to vector<8x8xf32>
    %61 = arith.mulf %59, %60 : vector<8x8xf32>
    %cst_17 = arith.constant -1.000000e+30 : f32
    %62 = vector.broadcast %cst_17 : f32 to vector<8x8xf32>
    %63 = arith.select %40, %61, %62 : vector<8x8xi1>, vector<8x8xf32>
    %cst_18 = arith.constant dense<0xFF800000> : vector<8xf32>
    %64 = vector.multi_reduction <maximumf>, %63, %cst_18 [1] : vector<8x8xf32> to vector<8xf32>
    %65 = vector.shape_cast %64 : vector<8xf32> to vector<8x1xf32>
    %66 = vector.broadcast %65 : vector<8x1xf32> to vector<8x8xf32>
    %67 = arith.subf %63, %66 : vector<8x8xf32>
    %68 = math.exp %67 : vector<8x8xf32>
    %cst_19 = arith.constant dense<0.000000e+00> : vector<8xf32>
    %69 = vector.multi_reduction <add>, %68, %cst_19 [1] : vector<8x8xf32> to vector<8xf32>
    %70 = vector.shape_cast %69 : vector<8xf32> to vector<8x1xf32>
    %71 = tpu.reciprocal %70 {approx = true} : vector<8x1xf32> -> vector<8x1xf32>
    %72 = vector.broadcast %71 : vector<8x1xf32> to vector<8x8xf32>
    %73 = arith.mulf %68, %72 : vector<8x8xf32>
    %cst_20 = arith.constant dense<0.000000e+00> : vector<8x32xf32>
    %74 = tpu.matmul %73, %7, %cst_20 {dimension_numbers = #tpu.dot_dimension_numbers<[1], [0], [0], [1], [0, 0, 1, 1], [], []>} : vector<8x8xf32>, vector<8x32xf32>, vector<8x32xf32> -> vector<8x32xf32>
    %75 = vector.extract_strided_slice %5 {offsets = [0, 32], sizes = [8, 32], strides = [1, 1]} : vector<8x256xf32> to vector<8x32xf32>
    %76 = vector.extract_strided_slice %75 {offsets = [0, 0], sizes = [8, 16], strides = [1, 1]} : vector<8x32xf32> to vector<8x16xf32>
    %77 = vector.extract_strided_slice %75 {offsets = [0, 16], sizes = [8, 16], strides = [1, 1]} : vector<8x32xf32> to vector<8x16xf32>
    %78 = arith.mulf %75, %1 : vector<8x32xf32>
    %cst_21 = arith.constant 0.000000e+00 : f32
    %79 = vector.broadcast %cst_21 : f32 to vector<8x16xf32>
    %80 = arith.subf %79, %77 : vector<8x16xf32>
    %81 = tpu.concatenate %80, %76 in 1 : vector<8x16xf32>, vector<8x16xf32> -> vector<8x32xf32>
    %82 = arith.mulf %81, %2 : vector<8x32xf32>
    %83 = arith.addf %78, %82 : vector<8x32xf32>
    %84 = arith.mulf %83, %83 : vector<8x32xf32>
    %cst_22 = arith.constant dense<0.000000e+00> : vector<8xf32>
    %85 = vector.multi_reduction <add>, %84, %cst_22 [1] : vector<8x32xf32> to vector<8xf32>
    %86 = vector.shape_cast %85 : vector<8xf32> to vector<8x1xf32>
    %87 = math.rsqrt %86 : vector<8x1xf32>
    %88 = vector.broadcast %87 : vector<8x1xf32> to vector<8x32xf32>
    %89 = arith.mulf %83, %88 : vector<8x32xf32>
    %90 = vector.extract_strided_slice %3 {offsets = [0, 32], sizes = [1, 32], strides = [1, 1]} : vector<1x128xf32> to vector<1x32xf32>
    %91 = vector.broadcast %90 : vector<1x32xf32> to vector<8x32xf32>
    %92 = arith.mulf %89, %91 : vector<8x32xf32>
    %cst_23 = arith.constant dense<0.000000e+00> : vector<8x8xf32>
    %93 = tpu.matmul %92, %21, %cst_23 {dimension_numbers = #tpu.dot_dimension_numbers<[1], [1], [0], [0], [0, 0, 1, 0], [], []>} : vector<8x32xf32>, vector<8x32xf32>, vector<8x8xf32> -> vector<8x8xf32>
    %cst_24 = arith.constant 5.65685415 : f32
    %94 = vector.broadcast %cst_24 : f32 to vector<8x8xf32>
    %95 = arith.mulf %93, %94 : vector<8x8xf32>
    %cst_25 = arith.constant -1.000000e+30 : f32
    %96 = vector.broadcast %cst_25 : f32 to vector<8x8xf32>
    %97 = arith.select %40, %95, %96 : vector<8x8xi1>, vector<8x8xf32>
    %cst_26 = arith.constant dense<0xFF800000> : vector<8xf32>
    %98 = vector.multi_reduction <maximumf>, %97, %cst_26 [1] : vector<8x8xf32> to vector<8xf32>
    %99 = vector.shape_cast %98 : vector<8xf32> to vector<8x1xf32>
    %100 = vector.broadcast %99 : vector<8x1xf32> to vector<8x8xf32>
    %101 = arith.subf %97, %100 : vector<8x8xf32>
    %102 = math.exp %101 : vector<8x8xf32>
    %cst_27 = arith.constant dense<0.000000e+00> : vector<8xf32>
    %103 = vector.multi_reduction <add>, %102, %cst_27 [1] : vector<8x8xf32> to vector<8xf32>
    %104 = vector.shape_cast %103 : vector<8xf32> to vector<8x1xf32>
    %105 = tpu.reciprocal %104 {approx = true} : vector<8x1xf32> -> vector<8x1xf32>
    %106 = vector.broadcast %105 : vector<8x1xf32> to vector<8x8xf32>
    %107 = arith.mulf %102, %106 : vector<8x8xf32>
    %cst_28 = arith.constant dense<0.000000e+00> : vector<8x32xf32>
    %108 = tpu.matmul %107, %7, %cst_28 {dimension_numbers = #tpu.dot_dimension_numbers<[1], [0], [0], [1], [0, 0, 1, 1], [], []>} : vector<8x8xf32>, vector<8x32xf32>, vector<8x32xf32> -> vector<8x32xf32>
    %109 = vector.extract_strided_slice %5 {offsets = [0, 64], sizes = [8, 32], strides = [1, 1]} : vector<8x256xf32> to vector<8x32xf32>
    %110 = vector.extract_strided_slice %109 {offsets = [0, 0], sizes = [8, 16], strides = [1, 1]} : vector<8x32xf32> to vector<8x16xf32>
    %111 = vector.extract_strided_slice %109 {offsets = [0, 16], sizes = [8, 16], strides = [1, 1]} : vector<8x32xf32> to vector<8x16xf32>
    %112 = arith.mulf %109, %1 : vector<8x32xf32>
    %cst_29 = arith.constant 0.000000e+00 : f32
    %113 = vector.broadcast %cst_29 : f32 to vector<8x16xf32>
    %114 = arith.subf %113, %111 : vector<8x16xf32>
    %115 = tpu.concatenate %114, %110 in 1 : vector<8x16xf32>, vector<8x16xf32> -> vector<8x32xf32>
    %116 = arith.mulf %115, %2 : vector<8x32xf32>
    %117 = arith.addf %112, %116 : vector<8x32xf32>
    %118 = arith.mulf %117, %117 : vector<8x32xf32>
    %cst_30 = arith.constant dense<0.000000e+00> : vector<8xf32>
    %119 = vector.multi_reduction <add>, %118, %cst_30 [1] : vector<8x32xf32> to vector<8xf32>
    %120 = vector.shape_cast %119 : vector<8xf32> to vector<8x1xf32>
    %121 = math.rsqrt %120 : vector<8x1xf32>
    %122 = vector.broadcast %121 : vector<8x1xf32> to vector<8x32xf32>
    %123 = arith.mulf %117, %122 : vector<8x32xf32>
    %124 = vector.extract_strided_slice %3 {offsets = [0, 64], sizes = [1, 32], strides = [1, 1]} : vector<1x128xf32> to vector<1x32xf32>
    %125 = vector.broadcast %124 : vector<1x32xf32> to vector<8x32xf32>
    %126 = arith.mulf %123, %125 : vector<8x32xf32>
    %cst_31 = arith.constant dense<0.000000e+00> : vector<8x8xf32>
    %127 = tpu.matmul %126, %37, %cst_31 {dimension_numbers = #tpu.dot_dimension_numbers<[1], [1], [0], [0], [0, 0, 1, 0], [], []>} : vector<8x32xf32>, vector<8x32xf32>, vector<8x8xf32> -> vector<8x8xf32>
    %cst_32 = arith.constant 5.65685415 : f32
    %128 = vector.broadcast %cst_32 : f32 to vector<8x8xf32>
    %129 = arith.mulf %127, %128 : vector<8x8xf32>
    %cst_33 = arith.constant -1.000000e+30 : f32
    %130 = vector.broadcast %cst_33 : f32 to vector<8x8xf32>
    %131 = arith.select %40, %129, %130 : vector<8x8xi1>, vector<8x8xf32>
    %cst_34 = arith.constant dense<0xFF800000> : vector<8xf32>
    %132 = vector.multi_reduction <maximumf>, %131, %cst_34 [1] : vector<8x8xf32> to vector<8xf32>
    %133 = vector.shape_cast %132 : vector<8xf32> to vector<8x1xf32>
    %134 = vector.broadcast %133 : vector<8x1xf32> to vector<8x8xf32>
    %135 = arith.subf %131, %134 : vector<8x8xf32>
    %136 = math.exp %135 : vector<8x8xf32>
    %cst_35 = arith.constant dense<0.000000e+00> : vector<8xf32>
    %137 = vector.multi_reduction <add>, %136, %cst_35 [1] : vector<8x8xf32> to vector<8xf32>
    %138 = vector.shape_cast %137 : vector<8xf32> to vector<8x1xf32>
    %139 = tpu.reciprocal %138 {approx = true} : vector<8x1xf32> -> vector<8x1xf32>
    %140 = vector.broadcast %139 : vector<8x1xf32> to vector<8x8xf32>
    %141 = arith.mulf %136, %140 : vector<8x8xf32>
    %cst_36 = arith.constant dense<0.000000e+00> : vector<8x32xf32>
    %142 = tpu.matmul %141, %23, %cst_36 {dimension_numbers = #tpu.dot_dimension_numbers<[1], [0], [0], [1], [0, 0, 1, 1], [], []>} : vector<8x8xf32>, vector<8x32xf32>, vector<8x32xf32> -> vector<8x32xf32>
    %143 = vector.extract_strided_slice %5 {offsets = [0, 96], sizes = [8, 32], strides = [1, 1]} : vector<8x256xf32> to vector<8x32xf32>
    %144 = vector.extract_strided_slice %143 {offsets = [0, 0], sizes = [8, 16], strides = [1, 1]} : vector<8x32xf32> to vector<8x16xf32>
    %145 = vector.extract_strided_slice %143 {offsets = [0, 16], sizes = [8, 16], strides = [1, 1]} : vector<8x32xf32> to vector<8x16xf32>
    %146 = arith.mulf %143, %1 : vector<8x32xf32>
    %cst_37 = arith.constant 0.000000e+00 : f32
    %147 = vector.broadcast %cst_37 : f32 to vector<8x16xf32>
    %148 = arith.subf %147, %145 : vector<8x16xf32>
    %149 = tpu.concatenate %148, %144 in 1 : vector<8x16xf32>, vector<8x16xf32> -> vector<8x32xf32>
    %150 = arith.mulf %149, %2 : vector<8x32xf32>
    %151 = arith.addf %146, %150 : vector<8x32xf32>
    %152 = arith.mulf %151, %151 : vector<8x32xf32>
    %cst_38 = arith.constant dense<0.000000e+00> : vector<8xf32>
    %153 = vector.multi_reduction <add>, %152, %cst_38 [1] : vector<8x32xf32> to vector<8xf32>
    %154 = vector.shape_cast %153 : vector<8xf32> to vector<8x1xf32>
    %155 = math.rsqrt %154 : vector<8x1xf32>
    %156 = vector.broadcast %155 : vector<8x1xf32> to vector<8x32xf32>
    %157 = arith.mulf %151, %156 : vector<8x32xf32>
    %158 = vector.extract_strided_slice %3 {offsets = [0, 96], sizes = [1, 32], strides = [1, 1]} : vector<1x128xf32> to vector<1x32xf32>
    %159 = vector.broadcast %158 : vector<1x32xf32> to vector<8x32xf32>
    %160 = arith.mulf %157, %159 : vector<8x32xf32>
    %cst_39 = arith.constant dense<0.000000e+00> : vector<8x8xf32>
    %161 = tpu.matmul %160, %37, %cst_39 {dimension_numbers = #tpu.dot_dimension_numbers<[1], [1], [0], [0], [0, 0, 1, 0], [], []>} : vector<8x32xf32>, vector<8x32xf32>, vector<8x8xf32> -> vector<8x8xf32>
    %cst_40 = arith.constant 5.65685415 : f32
    %162 = vector.broadcast %cst_40 : f32 to vector<8x8xf32>
    %163 = arith.mulf %161, %162 : vector<8x8xf32>
    %cst_41 = arith.constant -1.000000e+30 : f32
    %164 = vector.broadcast %cst_41 : f32 to vector<8x8xf32>
    %165 = arith.select %40, %163, %164 : vector<8x8xi1>, vector<8x8xf32>
    %cst_42 = arith.constant dense<0xFF800000> : vector<8xf32>
    %166 = vector.multi_reduction <maximumf>, %165, %cst_42 [1] : vector<8x8xf32> to vector<8xf32>
    %167 = vector.shape_cast %166 : vector<8xf32> to vector<8x1xf32>
    %168 = vector.broadcast %167 : vector<8x1xf32> to vector<8x8xf32>
    %169 = arith.subf %165, %168 : vector<8x8xf32>
    %170 = math.exp %169 : vector<8x8xf32>
    %cst_43 = arith.constant dense<0.000000e+00> : vector<8xf32>
    %171 = vector.multi_reduction <add>, %170, %cst_43 [1] : vector<8x8xf32> to vector<8xf32>
    %172 = vector.shape_cast %171 : vector<8xf32> to vector<8x1xf32>
    %173 = tpu.reciprocal %172 {approx = true} : vector<8x1xf32> -> vector<8x1xf32>
    %174 = vector.broadcast %173 : vector<8x1xf32> to vector<8x8xf32>
    %175 = arith.mulf %170, %174 : vector<8x8xf32>
    %cst_44 = arith.constant dense<0.000000e+00> : vector<8x32xf32>
    %176 = tpu.matmul %175, %23, %cst_44 {dimension_numbers = #tpu.dot_dimension_numbers<[1], [0], [0], [1], [0, 0, 1, 1], [], []>} : vector<8x8xf32>, vector<8x32xf32>, vector<8x32xf32> -> vector<8x32xf32>
    %177 = tpu.concatenate %74, %108, %142, %176 in 1 : vector<8x32xf32>, vector<8x32xf32>, vector<8x32xf32>, vector<8x32xf32> -> vector<8x128xf32>
    %c0_45 = arith.constant 0 : index
    %c0_46 = arith.constant 0 : index
    %178 = vector.load %arg4[%c0_45, %c0_46] : memref<128x128xf32, #tpu.memory_space<vmem>>, vector<128x128xf32>
    %cst_47 = arith.constant dense<0.000000e+00> : vector<8x128xf32>
    %179 = tpu.matmul %177, %178, %cst_47 {dimension_numbers = #tpu.dot_dimension_numbers<[1], [0], [0], [1], [0, 0, 1, 1], [], []>} : vector<8x128xf32>, vector<128x128xf32>, vector<8x128xf32> -> vector<8x128xf32>
    %c0_48 = arith.constant 0 : index
    %c0_49 = arith.constant 0 : index
    %180 = vector.load %arg9[%c0_48, %c0_49] : memref<1x128xf32, #tpu.memory_space<vmem>>, vector<1x128xf32>
    %181 = arith.mulf %0, %0 : vector<8x128xf32>
    %cst_50 = arith.constant dense<0.000000e+00> : vector<8xf32>
    %182 = vector.multi_reduction <add>, %181, %cst_50 [1] : vector<8x128xf32> to vector<8xf32>
    %183 = vector.shape_cast %182 : vector<8xf32> to vector<8x1xf32>
    %184 = math.rsqrt %183 : vector<8x1xf32>
    %185 = vector.broadcast %184 : vector<8x1xf32> to vector<8x128xf32>
    %186 = arith.mulf %0, %185 : vector<8x128xf32>
    %187 = arith.mulf %179, %179 : vector<8x128xf32>
    %cst_51 = arith.constant dense<0.000000e+00> : vector<8xf32>
    %188 = vector.multi_reduction <add>, %187, %cst_51 [1] : vector<8x128xf32> to vector<8xf32>
    %189 = vector.shape_cast %188 : vector<8xf32> to vector<8x1xf32>
    %190 = math.rsqrt %189 : vector<8x1xf32>
    %191 = vector.broadcast %190 : vector<8x1xf32> to vector<8x128xf32>
    %192 = arith.mulf %179, %191 : vector<8x128xf32>
    %193 = arith.subf %192, %186 : vector<8x128xf32>
    %194 = vector.broadcast %180 : vector<1x128xf32> to vector<8x128xf32>
    %195 = arith.mulf %194, %193 : vector<8x128xf32>
    %196 = arith.addf %186, %195 : vector<8x128xf32>
    %197 = arith.mulf %196, %196 : vector<8x128xf32>
    %cst_52 = arith.constant dense<0.000000e+00> : vector<8xf32>
    %198 = vector.multi_reduction <add>, %197, %cst_52 [1] : vector<8x128xf32> to vector<8xf32>
    %199 = vector.shape_cast %198 : vector<8xf32> to vector<8x1xf32>
    %200 = math.rsqrt %199 : vector<8x1xf32>
    %201 = vector.broadcast %200 : vector<8x1xf32> to vector<8x128xf32>
    %202 = arith.mulf %196, %201 : vector<8x128xf32>
    %c0_53 = arith.constant 0 : index
    %c0_54 = arith.constant 0 : index
    %203 = vector.load %arg5[%c0_53, %c0_54] : memref<128x256xf32, #tpu.memory_space<vmem>>, vector<128x256xf32>
    %cst_55 = arith.constant dense<0.000000e+00> : vector<8x256xf32>
    %204 = tpu.matmul %202, %203, %cst_55 {dimension_numbers = #tpu.dot_dimension_numbers<[1], [0], [0], [1], [0, 0, 1, 1], [], []>} : vector<8x128xf32>, vector<128x256xf32>, vector<8x256xf32> -> vector<8x256xf32>
    %c0_56 = arith.constant 0 : index
    %c0_57 = arith.constant 0 : index
    %205 = vector.load %arg8[%c0_56, %c0_57] : memref<1x256xf32, #tpu.memory_space<vmem>>, vector<1x256xf32>
    %206 = vector.broadcast %205 : vector<1x256xf32> to vector<8x256xf32>
    %207 = arith.mulf %206, %204 : vector<8x256xf32>
    %208 = arith.negf %207 : vector<8x256xf32>
    %209 = math.exp %208 : vector<8x256xf32>
    %cst_58 = arith.constant 1.000000e+00 : f32
    %210 = vector.broadcast %cst_58 : f32 to vector<8x256xf32>
    %211 = arith.addf %210, %209 : vector<8x256xf32>
    %212 = arith.divf %210, %211 : vector<8x256xf32>
    %213 = arith.mulf %207, %212 : vector<8x256xf32>
    %c0_59 = arith.constant 0 : index
    %c0_60 = arith.constant 0 : index
    %214 = vector.load %arg6[%c0_59, %c0_60] : memref<256x128xf32, #tpu.memory_space<vmem>>, vector<256x128xf32>
    %cst_61 = arith.constant dense<0.000000e+00> : vector<8x128xf32>
    %215 = tpu.matmul %213, %214, %cst_61 {dimension_numbers = #tpu.dot_dimension_numbers<[1], [0], [0], [1], [0, 0, 1, 1], [], []>} : vector<8x256xf32>, vector<256x128xf32>, vector<8x128xf32> -> vector<8x128xf32>
    %c0_62 = arith.constant 0 : index
    %c0_63 = arith.constant 0 : index
    %216 = vector.load %arg10[%c0_62, %c0_63] : memref<1x128xf32, #tpu.memory_space<vmem>>, vector<1x128xf32>
    %217 = arith.mulf %202, %202 : vector<8x128xf32>
    %cst_64 = arith.constant dense<0.000000e+00> : vector<8xf32>
    %218 = vector.multi_reduction <add>, %217, %cst_64 [1] : vector<8x128xf32> to vector<8xf32>
    %219 = vector.shape_cast %218 : vector<8xf32> to vector<8x1xf32>
    %220 = math.rsqrt %219 : vector<8x1xf32>
    %221 = vector.broadcast %220 : vector<8x1xf32> to vector<8x128xf32>
    %222 = arith.mulf %202, %221 : vector<8x128xf32>
    %223 = arith.mulf %215, %215 : vector<8x128xf32>
    %cst_65 = arith.constant dense<0.000000e+00> : vector<8xf32>
    %224 = vector.multi_reduction <add>, %223, %cst_65 [1] : vector<8x128xf32> to vector<8xf32>
    %225 = vector.shape_cast %224 : vector<8xf32> to vector<8x1xf32>
    %226 = math.rsqrt %225 : vector<8x1xf32>
    %227 = vector.broadcast %226 : vector<8x1xf32> to vector<8x128xf32>
    %228 = arith.mulf %215, %227 : vector<8x128xf32>
    %229 = arith.subf %228, %222 : vector<8x128xf32>
    %230 = vector.broadcast %216 : vector<1x128xf32> to vector<8x128xf32>
    %231 = arith.mulf %230, %229 : vector<8x128xf32>
    %232 = arith.addf %222, %231 : vector<8x128xf32>
    %233 = arith.mulf %232, %232 : vector<8x128xf32>
    %cst_66 = arith.constant dense<0.000000e+00> : vector<8xf32>
    %234 = vector.multi_reduction <add>, %233, %cst_66 [1] : vector<8x128xf32> to vector<8xf32>
    %235 = vector.shape_cast %234 : vector<8xf32> to vector<8x1xf32>
    %236 = math.rsqrt %235 : vector<8x1xf32>
    %237 = vector.broadcast %236 : vector<8x1xf32> to vector<8x128xf32>
    %238 = arith.mulf %232, %237 : vector<8x128xf32>
    %c0_67 = arith.constant 0 : index
    %c0_68 = arith.constant 0 : index
    %239 = vector.load %arg11[%c0_67, %c0_68] : memref<8x128xf32, #tpu.memory_space<vmem>>, vector<8x128xf32>
    tpu.vector_store %arg11[%c0_67, %c0_68], %238 {strides = array<i32>} : memref<8x128xf32, #tpu.memory_space<vmem>>, vector<8x128xf32>,
    return
  }
}

</mosaic_0001>

<bundles_post_ra>
// kernel: ngpt_decoder_layer.1
= control target key start
LH: loop header
LB: loop body
LE: loop exit
PB: predicated region body
PF: predicated region fallthrough
CT: control target
= control target key end

     0   :  { %16 = vsyncpa [#allocation3], 0  ;;  %s1480_s0 = inlined_call_operand.vmem [shape: f32[8,128], index: 0, kind: input, shape index: {}]   ;;  %s1481_s1 = inlined_call_operand.vmem [shape: f32[8,32], index: 1, kind: input, shape index: {}]   ;;  %s1482_s2 = inlined_call_operand.vmem [shape: f32[8,32], index: 2, kind: input, shape index: {}]   ;;  %s1483_s3 = inlined_call_operand.hbm [shape: f32[128,256], index: 3, kind: input, shape index: {}]   ;;  %s1484_s4 = inlined_call_operand.hbm [shape: f32[128,128], index: 4, kind: input, shape index: {}]   ;;  %s1485_s5 = inlined_call_operand.hbm [shape: f32[128,256], index: 5, kind: input, shape index: {}]   ;;  %s1486_s6 = inlined_call_operand.hbm [shape: f32[256,128], index: 6, kind: input, shape index: {}]   ;;  %s1487_s7 = inlined_call_operand.vmem [shape: f32[1,128], index: 7, kind: input, shape index: {}]   ;;  %s1488_s8 = inlined_call_operand.vmem [shape: f32[1,256], index: 8, kind: input, shape index: {}]   ;;  %s1489_s9 = inlined_call_operand.vmem [shape: f32[1,128], index: 9, kind: input, shape index: {}]   ;;  %s1490_s10 = inlined_call_operand.vmem [shape: f32[1,128], index: 10, kind: input, shape index: {}]   ;;  %s1491_s11 = inlined_call_operand.hbm [shape: f32[8,128], index: 11, kind: output, shape index: {}]  }
   0x1   :  { %17 = vsyncpa [#allocation6], 0 }
   0x2   :  { %18 = vsyncpa [#allocation9], 0  ;;  %s43_s19 = sshll.u32 %s1484_s4, 4  ;;  %s44_s19 = int_to_ptr.hbm [resolvable:$true] %s43_s19 }
   0x3   :  { %19 = vsyncpa [#allocation4], 0  ;;  %s1218_s20 = smov [#allocation5]   ;;  %s30_s24 = sshll.u32 %s1483_s3, 4  ;;  %s31_s24 = int_to_ptr.hbm [resolvable:$true] %s30_s24 }
   0x4   :  { %s45_s21 = sshll.u32 %s1218_s20, 4  ;;  %s1219_s25 = smov 128   ;;  %s46_s21 = int_to_ptr.vmem [resolvable:$true] %s45_s21 }
   0x5   :  { %s1220_s26 = smov 8   ;;  %s1221_s27 = smov [#allocation2]  }
   0x6   :  { %51 = dma.hbm_to_vmem [thread:$0]  %s44_s19, 2048, %s46_s21, [#allocation6], %s1219_s25, %s1219_s25, %s1220_s26  }
   0x7   :  { %s32_s28 = sshll.u32 %s1221_s27, 4  ;;  %s1222_s29 = smov 256   ;;  %s33_s28 = int_to_ptr.vmem [resolvable:$true] %s32_s28 }
   0x8   :  { %s1223_s30 = smov 16   ;;  %s56_s13 = sshll.u32 %s1485_s5, 4  ;;  %s57_s13 = int_to_ptr.hbm [resolvable:$true] %s56_s13 }
   0x9   :  { %38 = dma.hbm_to_vmem [thread:$0]  %s31_s24, 4096, %s33_s28, [#allocation3], %s1222_s29, %s1222_s29, %s1223_s30  }
   0xa   :  { %s1224_s14 = smov [#allocation7]   ;;  %s69_s17 = sshll.u32 %s1486_s6, 4  ;;  %s70_s17 = int_to_ptr.hbm [resolvable:$true] %s69_s17 }
   0xb   :  { %s58_s15 = sshll.u32 %s1224_s14, 4  ;;  %s1225_s18 = smov [#allocation8]   ;;  %s59_s15 = int_to_ptr.vmem [resolvable:$true] %s58_s15 }
   0xc   :  { %64 = dma.hbm_to_vmem [thread:$0]  %s57_s13, 4096, %s59_s15, [#allocation6], %s1222_s29, %s1222_s29, %s1223_s30  }
   0xd   :  { %s71_s19 = sshll.u32 %s1225_s18, 4  ;;  %s72_s19 = int_to_ptr.vmem [resolvable:$true] %s71_s19 }
   0xe   :  { %77 = dma.hbm_to_vmem [thread:$0]  %s70_s17, 4096, %s72_s19, [#allocation9], %s1219_s25, %s1219_s25, %s1220_s26  }
   0xf   :  { %1210 = dma.done.wait [#allocation3], 4096  }
  0x10   :  { %1211 = vsyncadd [#allocation3], 4294963200 }
  0x11   :  { %1212 = dma.done.wait [#allocation6], 6144  }
  0x12   :  { %1213 = vsyncadd [#allocation6], 4294961152 }
  0x13   :  { %1214 = dma.done.wait [#allocation9], 4096  }
  0x14   :  { %1215 = vsyncadd [#allocation9], 4294963200  ;;  %v136_v0 = vld [vmem:[#allocation2 + $0xf0] sm:$0xff]  ;;  %v137_v1 = vld [vmem:[#allocation2 + $0xf8] sm:$0xff]  ;;  %s1226_s20 = smov 112   ;;  %s1227_s21 = smov 48  }
  0x15   :  { %v134_v2 = vld [vmem:[#allocation2 + $0xe0] sm:$0xff]  ;;  %138 = vmatpush.msra.mxu0 %v136_v0  ;;  %158 = vmatpush.msra.mxu1 %v137_v1  ;;  %v135_v3 = vld [vmem:[#allocation2 + $0xe8] sm:$0xff]  ;;  %v132_v4 = vld [vmem:[#allocation2 + $0xd0] sm:$0xff]  ;;  %s1229_s24 = smov 32   ;;  %s1230_s25 = smov 64   ;;  %vm188_vm0 = vcmask 130048  }
  0x16   :  { %v133_v5 = vld [vmem:[#allocation2 + $0xd8] sm:$0xff]  ;;  %v130_v6 = vld [vmem:[#allocation2 + $0xc0] sm:$0xff]  ;;  %v131_v7 = vld [vmem:[#allocation2 + $0xc8] sm:$0xff]  ;;  %s1231_s26 = smov 96   ;;  %vm193_vm1 = vcmask 261120   ;;  %s1232_s12 = smov [#allocation10]  }
  0x17   :  { %139 = vmatpush.msra.mxu0 %v134_v2  ;;  %159 = vmatpush.msra.mxu1 %v135_v3  ;;  %v128_v8 = vld [vmem:[#allocation2 + $0xb0] sm:$0xff]  ;;  %v129_v9 = vld [vmem:[#allocation2 + $0xb8] sm:$0xff]  ;;  %v126_v10 = vld [vmem:[#allocation2 + $0xa0] sm:$0xff]  ;;  %s996_s13 = sshll.u32 %s1232_s12, 4  ;;  %s997_s13 = int_to_ptr.vmem [resolvable:$true] %s996_s13 }
  0x18   :  { %v127_v11 = vld [vmem:[#allocation2 + $0xa8] sm:$0xff]  ;;  %v124_v12 = vld [vmem:[#allocation2 + $0x90] sm:$0xff]  ;;  %v125_v13 = vld [vmem:[#allocation2 + $0x98] sm:$0xff] }
  0x19   :  { %140 = vmatpush.msra.mxu0 %v132_v4  ;;  %160 = vmatpush.msra.mxu1 %v133_v5  ;;  %v122_v14 = vld [vmem:[#allocation2 + $0x80] sm:$0xff]  ;;  %v123_v15 = vld [vmem:[#allocation2 + $0x88] sm:$0xff]  ;;  %v120_v16 = vld [vmem:[#allocation2 + $0x70] sm:$0xff] }
  0x1a   :  { %v121_v17 = vld [vmem:[#allocation2 + $0x78] sm:$0xff]  ;;  %v118_v18 = vld [vmem:[#allocation2 + $0x60] sm:$0xff]  ;;  %v119_v19 = vld [vmem:[#allocation2 + $0x68] sm:$0xff] }
  0x1b   :  { %141 = vmatpush.msra.mxu0 %v130_v6  ;;  %161 = vmatpush.msra.mxu1 %v131_v7  ;;  %v116_v20 = vld [vmem:[#allocation2 + $0x50] sm:$0xff]  ;;  %v117_v21 = vld [vmem:[#allocation2 + $0x58] sm:$0xff]  ;;  %v114_v22 = vld [vmem:[#allocation2 + $0x40] sm:$0xff] }
  0x1c   :  { %v115_v23 = vld [vmem:[#allocation2 + $0x48] sm:$0xff]  ;;  %v112_v24 = vld [vmem:[#allocation2 + $0x30] sm:$0xff]  ;;  %v113_v25 = vld [vmem:[#allocation2 + $0x38] sm:$0xff] }
  0x1d   :  { %142 = vmatpush.msra.mxu0 %v128_v8  ;;  %162 = vmatpush.msra.mxu1 %v129_v9  ;;  %v110_v26 = vld [vmem:[#allocation2 + $0x20] sm:$0xff]  ;;  %v111_v27 = vld [vmem:[#allocation2 + $0x28] sm:$0xff]  ;;  %v108_v28 = vld [vmem:[#allocation2 + $0x10] sm:$0xff] }
  0x1e   :  { %v109_v29 = vld [vmem:[#allocation2 + $0x18] sm:$0xff]  ;;  %v106_v30 = vld [vmem:[#allocation2] sm:$0xff]  ;;  %v107_v31 = vld [vmem:[#allocation2 + $0x8] sm:$0xff] }
  0x1f   :  { %143 = vmatpush.msra.mxu0 %v126_v10  ;;  %163 = vmatpush.msra.mxu1 %v127_v11  ;;  %v1310_v32 = vld [vmem:[%s1480_s0] sm:$0xff]  ;;  %s1228_s0 = smov 80  }
  0x20   :  { %v1333_v37 = vld [vmem:[%s1481_s1] sm:$0xff] }
  0x21   :  { %144 = vmatpush.msra.mxu0 %v124_v12  ;;  %164 = vmatpush.msra.mxu1 %v125_v13  ;;  %v1346_v42 = vld [vmem:[%s1482_s2] sm:$0xff] }
  0x23   :  { %145 = vmatpush.msra.mxu0 %v122_v14  ;;  %165 = vmatpush.msra.mxu1 %v123_v15 }
  0x25   :  { %146 = vmatpush.msra.mxu0 %v120_v16  ;;  %166 = vmatpush.msra.mxu1 %v121_v17 }
  0x27   :  { %147 = vmatpush.msra.mxu0 %v118_v18  ;;  %167 = vmatpush.msra.mxu1 %v119_v19 }
  0x29   :  { %148 = vmatpush.msra.mxu0 %v116_v20  ;;  %168 = vmatpush.msra.mxu1 %v117_v21 }
  0x2b   :  { %149 = vmatpush.msra.mxu0 %v114_v22  ;;  %169 = vmatpush.msra.mxu1 %v115_v23 }
  0x2d   :  { %150 = vmatpush.msra.mxu0 %v112_v24  ;;  %170 = vmatpush.msra.mxu1 %v113_v25 }
  0x2f   :  { %151 = vmatpush.msra.mxu0 %v110_v26  ;;  %171 = vmatpush.msra.mxu1 %v111_v27 }
  0x31   :  { %152 = vmatpush.msra.mxu0 %v108_v28  ;;  %172 = vmatpush.msra.mxu1 %v109_v29 }
  0x33   :  { %153 = vmatpush.msra.mxu0 %v106_v30  ;;  %173 = vmatpush.msra.mxu1 %v107_v31 }
  0x34   :  { %154 = vmatmul.f32.vlgmr.msra.gmra.mxu0 %v1310_v32  ;;  %174 = vmatmul.f32.vlgmr.msra.gmra.mxu1 %v1310_v32 }
  0xb1   :  { %v1314_v33 = vpop.f32.mrf.mxu0  ;;  %v1316_v34 = vpop.f32.mrf.mxu1 }
  0xb2   :  { %216 = vrot.lane.b32.xlu1 %v1316_v34, %s1226_s20  ;;  %v1321_v35 = vsub.f32 0.0, %v1314_v33  ;;  %v179_v36 = vsub.f32 0.0, %v1316_v34  ;;  %v178_v20 = vmul.f32 %v1316_v34, %v1333_v37  ;;  %v250_v30 = vmul.f32 %v1314_v33, %v1333_v37 }
  0xb4   :  { %447 = vrot.lane.b32.xlu2 %v1321_v35, %s1227_s21  ;;  %349 = vrot.lane.b32.xlu0 %v1321_v35, %s1228_s0 }
  0xba   :  { %213 = vrot.lane.b32.xlu1 %v179_v36, %s1228_s0 }
  0xbc   :  { %450 = vrot.lane.b32.xlu2 %v1314_v33, %s1228_s0  ;;  %352 = vrot.lane.b32.xlu0 %v1314_v33, %s1226_s20 }
  0xc2   :  { %556 = vrot.lane.b32.xlu1 %v1314_v33, %s1227_s21 }
  0xc4   :  { %209 = vrot.lane.b32.xlu2 %v1333_v37, %s1229_s24  ;;  %553 = vrot.lane.b32.xlu0 %v1321_v35, %s1223_s30 }
  0xca   :  { %443 = vrot.lane.b32.xlu1 %v1333_v37, %s1230_s25 }
  0xd2   :  { %549 = vrot.lane.b32.xlu1 %v1333_v37, %s1231_s26 }
 0x10e   :  { %v448_v40 = vpop.permute.xlu2 %447 }
 0x116   :  { %v451_v48 = vpop.permute.xlu2 %450 }
 0x117   :  { %v453_v49 = vsel %vm188_vm0, %v448_v40, %v451_v48 }
 0x118   :  { %v454_v53 = vmul.f32 %v453_v49, %v1346_v42 }
 0x11e   :  { %v210_v55 = vpop.permute.xlu2 %209 }
 0x11f   :  { %v212_v56 = vmul.f32 %v210_v55, %v1316_v34  ;;  %v348_v61 = vmul.f32 %v210_v55, %v1314_v33 }
 0x124   :  { %v217_v38 = vpop.permute.xlu1 %216 }
 0x126   :  { %v350_v39 = vpop.permute.xlu0 %349 }
 0x12c   :  { %v214_v41 = vpop.permute.xlu1 %213 }
 0x12d   :  { %v219_v43 = vsel %vm188_vm0, %v214_v41, %v217_v38 }
 0x12e   :  { %v220_v44 = vmul.f32 %v219_v43, %v1346_v42  ;;  %v353_v45 = vpop.permute.xlu0 %352 }
 0x12f   :  { %v355_v46 = vsel %vm188_vm0, %v350_v39, %v353_v45 }
 0x130   :  { %v356_v47 = vmul.f32 %v355_v46, %v1346_v42  ;;  %222 = vrot.lane.b32.xlu2 %v220_v44, %s1229_s24 }
 0x132   :  { %358 = vrot.lane.b32.xlu0 %v356_v47, %s1229_s24 }
 0x134   :  { %v557_v50 = vpop.permute.xlu1 %556 }
 0x136   :  { %v554_v51 = vpop.permute.xlu0 %553 }
 0x137   :  { %v559_v52 = vsel %vm188_vm0, %v554_v51, %v557_v50 }
 0x138   :  { %v560_v54 = vmul.f32 %v559_v52, %v1346_v42 }
 0x13a   :  { %456 = vrot.lane.b32.xlu0 %v454_v53, %s1230_s25  ;;  %562 = vrot.lane.b32.xlu2 %v560_v54, %s1231_s26  ;;  %v1039_v53 = vld [vmem:[%s1487_s7] ss:$0 sm:$0xff] }
 0x13c   :  { %v444_v60 = vpop.permute.xlu1 %443 }
 0x13d   :  { %v446_v4 = vmul.f32 %v444_v60, %v1314_v33 }
 0x144   :  { %v550_v0 = vpop.permute.xlu1 %549 }
 0x145   :  { %v552_v3 = vmul.f32 %v550_v0, %v1314_v33 }
 0x18a   :  { %v223_v57 = vpop.permute.xlu2 %222 }
 0x18b   :  { %v1361_v58 = vadd.f32 %v223_v57, %v212_v56 }
 0x18d   :  { %v226_v59 = vmul.f32 %v1361_v58, %v1361_v58 }
 0x18f   :  { %228 = vrot.lane.b32.xlu1 %v226_v59, %s1231_s26 }
 0x194   :  { %v563_v2 = vpop.permute.xlu2 %562 }
 0x195   :  { %v1377_v5 = vadd.f32 %v563_v2, %v552_v3 }
 0x197   :  { %181 = vrot.lane.b32.xlu1 %v179_v36, %s1226_s20  ;;  %v566_v8 = vmul.f32 %v1377_v5, %v1377_v5 }
 0x19f   :  { %257 = vrot.lane.b32.xlu1 %v1314_v33, %s1223_s30 }
 0x1a4   :  { %v359_v62 = vpop.permute.xlu0 %358 }
 0x1a5   :  { %v1370_v63 = vadd.f32 %v359_v62, %v348_v61 }
 0x1a7   :  { %v362_v1 = vmul.f32 %v1370_v63, %v1370_v63 }
 0x1a9   :  { %364 = vrot.lane.b32.xlu0 %v362_v1, %s1231_s26 }
 0x1ac   :  { %v457_v6 = vpop.permute.xlu0 %456 }
 0x1ad   :  { %v1379_v7 = vadd.f32 %v457_v6, %v446_v4 }
 0x1af   :  { %v460_v9 = vmul.f32 %v1379_v7, %v1379_v7 }
 0x1b1   :  { %568 = vrot.lane.b32.xlu0 %v566_v8, %s1229_s24  ;;  %462 = vrot.lane.b32.xlu2 %v460_v9, %s1230_s25 }
 0x1b9   :  { %253 = vrot.lane.b32.xlu0 %v1321_v35, %s1226_s20  ;;  %185 = vrot.lane.b32.xlu2 %v1316_v34, %s1223_s30 }
 0x201   :  { %v229_v10 = vpop.permute.xlu1 %228 }
 0x202   :  { %v231_v11 = vsel %vm193_vm1, %v229_v10, 0.0 }
 0x203   :  { %232 = vadd.xlane.f32.xlu0 %v231_v11 }
 0x209   :  { %v182_v16 = vpop.permute.xlu1 %181 }
 0x20b   :  { %v463_v12 = vpop.permute.xlu2 %462 }
 0x20c   :  { %v465_v13 = vsel %vm193_vm1, %v463_v12, 0.0 }
 0x20d   :  { %466 = vadd.xlane.f32.xlu1 %v465_v13 }
 0x211   :  { %v258_v25 = vpop.permute.xlu1 %257 }
 0x213   :  { %v186_v14 = vpop.permute.xlu2 %185 }
 0x214   :  { %v189_v18 = vsel %vm188_vm0, %v182_v16, %v186_v14 }
 0x215   :  { %v190_v19 = vmul.f32 %v189_v18, %v1346_v42 }
 0x217   :  { %v1399_v23 = vadd.f32 %v190_v19, %v178_v20 }
 0x219   :  { %v192_v24 = vmul.f32 %v1399_v23, %v1399_v23 }
 0x21b   :  { %v365_v15 = vpop.permute.xlu0 %364  ;;  %v194_v28 = vsel %vm193_vm1, %v192_v24, 0.0 }
 0x21c   :  { %v367_v17 = vsel %vm193_vm1, %v365_v15, 0.0 }
 0x21d   :  { %368 = vadd.xlane.f32.xlu2 %v367_v17 }
 0x223   :  { %v569_v21 = vpop.permute.xlu0 %568 }
 0x224   :  { %v571_v22 = vsel %vm193_vm1, %v569_v21, 0.0 }
 0x225   :  { %572 = vadd.xlane.f32.xlu2 %v571_v22 }
 0x22b   :  { %v254_v26 = vpop.permute.xlu0 %253 }
 0x22c   :  { %v260_v27 = vsel %vm188_vm0, %v254_v26, %v258_v25 }
 0x22d   :  { %v261_v29 = vmul.f32 %v260_v27, %v1346_v42  ;;  %195 = vadd.xlane.f32.xlu2 %v194_v28 }
 0x22f   :  { %v1408_v31 = vadd.f32 %v261_v29, %v250_v30 }
 0x231   :  { %v263_v35 = vmul.f32 %v1408_v31, %v1408_v31 }
 0x233   :  { %v264_v36 = vsel %vm193_vm1, %v263_v35, 0.0 }
 0x234   :  { %265 = vadd.xlane.f32.xlu0 %v264_v36 }
 0x276   :  { %v233_v38 = vpop.xlane.xlu0 %232 }
 0x277   :  { %1042 = vrsqrt.f32 %v233_v38  ;;  %vm240_vm3 = vweird.f32 %v233_v38 }
 0x27d   :  { %v1043_v39 = vpop.eup %1042 }
 0x27e   :  { %v235_v40 = vmul.f32 %v1043_v39, %v233_v38  ;;  %vm241_vm2 = vweird.f32 %v1043_v39 }
 0x27f   :  { %vm242_vm4 = vmor %vm240_vm3, %vm241_vm2 }
 0x280   :  { %v236_v41 = vmul.f32 %v1043_v39, %v235_v40  ;;  %v467_v43 = vpop.xlane.xlu1 %466  ;;  %v245_v40 = vlaneseq }
 0x281   :  { %1044 = vrsqrt.f32 %v467_v43  ;;  %vm474_vm6 = vweird.f32 %v467_v43 }
 0x282   :  { %v237_v42 = vmul.f32 0.5, %v236_v41  ;;  %v246_v41 = vshrl.u32 %v245_v40, 7 }
 0x284   :  { %v238_v44 = vsub.f32 1.5, %v237_v42 }
 0x286   :  { %v239_v45 = vmul.f32 %v1043_v39, %v238_v44 }
 0x287   :  { %v1045_v33 = vpop.eup %1044 }
 0x288   :  { %v469_v37 = vmul.f32 %v1045_v33, %v467_v43  ;;  %v243_v46 = vsel %vm242_vm4, %v1043_v39, %v239_v45  ;;  %vm475_vm5 = vweird.f32 %v1045_v33 }
 0x289   :  { %v244_v47 = vmul.f32 %v243_v46, %v1361_v58  ;;  %vm476_vm7 = vmor %vm474_vm6, %vm475_vm5  ;;  %vm310_vm6 = vcmask 64512  }
 0x28a   :  { %v470_v48 = vmul.f32 %v1045_v33, %v469_v37 }
 0x28b   :  { %484 = vrot.lane.b32.xlu2 %v244_v47, %s1231_s26 }
 0x28c   :  { %v471_v49 = vmul.f32 0.5, %v470_v48 }
 0x28e   :  { %v472_v50 = vsub.f32 1.5, %v471_v49 }
 0x290   :  { %v473_v51 = vmul.f32 %v1045_v33, %v472_v50  ;;  %v369_v52 = vpop.xlane.xlu2 %368 }
 0x291   :  { %1046 = vrsqrt.f32 %v369_v52  ;;  %vm376_vm9 = vweird.f32 %v369_v52 }
 0x292   :  { %v477_v54 = vsel %vm476_vm7, %v1045_v33, %v473_v51  ;;  %vm660_vm7 = vcmask 523264  }
 0x293   :  { %v478_v55 = vmul.f32 %v477_v54, %v1379_v7 }
 0x295   :  { %v479_v56 = vmul.f32 %v1039_v53, %v478_v55 }
 0x297   :  { %v1047_v57 = vpop.eup %1046  ;;  %481 = vrot.lane.b32.xlu0 %v479_v56, %s1230_s25 }
 0x298   :  { %v371_v58 = vmul.f32 %v1047_v57, %v369_v52  ;;  %v573_v59 = vpop.xlane.xlu2 %572  ;;  %vm377_vm8 = vweird.f32 %v1047_v57 }
 0x299   :  { %1048 = vrsqrt.f32 %v573_v59  ;;  %vm378_vm10 = vmor %vm376_vm9, %vm377_vm8  ;;  %vm580_vm12 = vweird.f32 %v573_v59  ;;  %vm662_vm8 = vcmask 785408  }
 0x29a   :  { %v372_v60 = vmul.f32 %v1047_v57, %v371_v58 }
 0x29c   :  { %v373_v61 = vmul.f32 0.5, %v372_v60 }
 0x29e   :  { %v374_v62 = vsub.f32 1.5, %v373_v61 }
 0x29f   :  { %v1049_v0 = vpop.eup %1048 }
 0x2a0   :  { %v375_v1 = vmul.f32 %v1047_v57, %v374_v62  ;;  %v575_v2 = vmul.f32 %v1049_v0, %v573_v59  ;;  %v196_v3 = vpop.xlane.xlu2 %195  ;;  %vm581_vm11 = vweird.f32 %v1049_v0 }
 0x2a1   :  { %1050 = vrsqrt.f32 %v196_v3  ;;  %vm582_vm13 = vmor %vm580_vm12, %vm581_vm11  ;;  %vm203_vm15 = vweird.f32 %v196_v3 }
 0x2a2   :  { %v379_v4 = vsel %vm378_vm10, %v1047_v57, %v375_v1  ;;  %v576_v6 = vmul.f32 %v1049_v0, %v575_v2 }
 0x2a3   :  { %v380_v7 = vmul.f32 %v379_v4, %v1370_v63 }
 0x2a4   :  { %v577_v8 = vmul.f32 0.5, %v576_v6 }
 0x2a5   :  { %v381_v9 = vmul.f32 %v1039_v53, %v380_v7 }
 0x2a6   :  { %v578_v10 = vsub.f32 1.5, %v577_v8 }
 0x2a7   :  { %v1051_v11 = vpop.eup %1050  ;;  %383 = vrot.lane.b32.xlu1 %v381_v9, %s1231_s26  ;;  %v266_v12 = vpop.xlane.xlu0 %265 }
 0x2a8   :  { %v579_v13 = vmul.f32 %v1049_v0, %v578_v10  ;;  %v198_v14 = vmul.f32 %v1051_v11, %v196_v3  ;;  %1052 = vrsqrt.f32 %v266_v12  ;;  %vm204_vm14 = vweird.f32 %v1051_v11 }
 0x2a9   :  { %vm205_vm0 = vmor %vm203_vm15, %vm204_vm14  ;;  %vm273_vm3 = vweird.f32 %v266_v12 }
 0x2aa   :  { %v583_v15 = vsel %vm582_vm13, %v1049_v0, %v579_v13  ;;  %v199_v16 = vmul.f32 %v1051_v11, %v198_v14 }
 0x2ab   :  { %v584_v17 = vmul.f32 %v583_v15, %v1377_v5 }
 0x2ac   :  { %v200_v18 = vmul.f32 0.5, %v199_v16 }
 0x2ad   :  { %v585_v19 = vmul.f32 %v1039_v53, %v584_v17 }
 0x2ae   :  { %v1053_v63 = vpop.eup %1052  ;;  %v201_v20 = vsub.f32 1.5, %v200_v18 }
 0x2af   :  { %v268_v21 = vmul.f32 %v1053_v63, %v266_v12  ;;  %587 = vrot.lane.b32.xlu1 %v585_v19, %s1229_s24  ;;  %vm274_vm2 = vweird.f32 %v1053_v63 }
 0x2b0   :  { %v202_v22 = vmul.f32 %v1051_v11, %v201_v20  ;;  %vm275_vm4 = vmor %vm273_vm3, %vm274_vm2 }
 0x2b1   :  { %v269_v24 = vmul.f32 %v1053_v63, %v268_v21 }
 0x2b2   :  { %v206_v25 = vsel %vm205_vm0, %v1051_v11, %v202_v22 }
 0x2b3   :  { %v270_v26 = vmul.f32 0.5, %v269_v24  ;;  %v207_v27 = vmul.f32 %v206_v25, %v1399_v23 }
 0x2b5   :  { %v271_v28 = vsub.f32 1.5, %v270_v26  ;;  %1010 = vmatpush.xpose.msk.msra.mxu2 %vm193_vm1, %v207_v27 }
 0x2b7   :  { %v272_v5 = vmul.f32 %v1053_v63, %v271_v28 }
 0x2b9   :  { %1013 = vmatpush.xpose.msk.msrb.mxu2 %vm193_vm1, %v207_v27  ;;  %v276_v29 = vsel %vm275_vm4, %v1053_v63, %v272_v5 }
 0x2ba   :  { %v277_v30 = vmul.f32 %v276_v29, %v1408_v31  ;;  %v248_v31 = vand.u32 127, %v245_v40  ;;  %v679_v29 = vld [vmem:[#allocation5 + $0x78] sm:$0xff]  ;;  %v672_v40 = vld [vmem:[#allocation5 + $0x40] sm:$0xff] }
 0x2bc   :  { %v281_v35 = vmul.f32 %v1039_v53, %v277_v30  ;;  %vm249_vm5 = vcmp.le.s32.totalorder %v248_v31, %v246_v41  ;;  %v678_v30 = vld [vmem:[#allocation5 + $0x70] sm:$0xff]  ;;  %v671_v41 = vld [vmem:[#allocation5 + $0x38] sm:$0xff] }
 0x2bd   :  { %v670_v31 = vld [vmem:[#allocation5 + $0x30] sm:$0xff] }
 0x2be   :  { %1011 = vmatmul.msk.f32.vlgmr.msra.gmra.mxu2 %vm193_vm1, %v281_v35  ;;  %v677_v35 = vld [vmem:[#allocation5 + $0x68] sm:$0xff] }
 0x2e5   :  { %v485_v36 = vpop.permute.xlu2 %484 }
 0x2e6   :  { %1016 = vmatpush.xpose.msk.msrb.mxu0 %vm193_vm1, %v485_v36  ;;  %1019 = vmatpush.xpose.msk.msra.mxu3 %vm193_vm1, %v485_v36  ;;  %v676_v36 = vld [vmem:[#allocation5 + $0x60] sm:$0xff] }
 0x2ea   :  { %680 = vmatpush.msrb.mxu3 %v679_v29  ;;  %v765_v29 = vld [vmem:[#allocation7 + $0x80] sm:$0xff] }
 0x2ec   :  { %681 = vmatpush.msrb.mxu3 %v678_v30  ;;  %v766_v30 = vld [vmem:[#allocation7 + $0x88] sm:$0xff] }
 0x2ee   :  { %682 = vmatpush.msrb.mxu3 %v677_v35  ;;  %v763_v35 = vld [vmem:[#allocation7 + $0x70] sm:$0xff] }
 0x2f0   :  { %683 = vmatpush.msrb.mxu3 %v676_v36  ;;  %v764_v36 = vld [vmem:[#allocation7 + $0x78] sm:$0xff] }
 0x309   :  { %v482_v23 = vpop.permute.xlu0 %481 }
 0x30a   :  { %1017 = vmatmul.msk.f32.vlgmr.msrb.gmra.mxu0 %vm193_vm1, %v482_v23  ;;  %v675_v23 = vld [vmem:[#allocation5 + $0x58] sm:$0xff] }
 0x30b   :  { %684 = vmatpush.msrb.mxu3 %v675_v23  ;;  %v762_v23 = vld [vmem:[#allocation7 + $0x68] sm:$0xff] }
 0x319   :  { %v384_v38 = vpop.permute.xlu1 %383 }
 0x31a   :  { %1014 = vmatmul.msk.f32.vlgmr.msrb.gmra.mxu2 %vm193_vm1, %v384_v38  ;;  %v674_v38 = vld [vmem:[#allocation5 + $0x50] sm:$0xff] }
 0x31b   :  { %685 = vmatpush.msrb.mxu3 %v674_v38  ;;  %v759_v38 = vld [vmem:[#allocation7 + $0x50] sm:$0xff] }
 0x321   :  { %v588_v39 = vpop.permute.xlu1 %587 }
 0x322   :  { %1020 = vmatmul.msk.f32.vlgmr.msra.gmra.mxu3 %vm193_vm1, %v588_v39  ;;  %v673_v39 = vld [vmem:[#allocation5 + $0x48] sm:$0xff] }
 0x323   :  { %686 = vmatpush.msrb.mxu3 %v673_v39  ;;  %v760_v39 = vld [vmem:[#allocation7 + $0x58] sm:$0xff] }
 0x325   :  { %687 = vmatpush.msrb.mxu3 %v672_v40  ;;  %v757_v40 = vld [vmem:[#allocation7 + $0x40] sm:$0xff] }
 0x327   :  { %688 = vmatpush.msrb.mxu3 %v671_v41  ;;  %v758_v41 = vld [vmem:[#allocation7 + $0x48] sm:$0xff] }
 0x329   :  { %689 = vmatpush.msrb.mxu3 %v670_v31  ;;  %v755_v31 = vld [vmem:[#allocation7 + $0x30] sm:$0xff] }
 0x341   :  { %v305_v44 = vpop.f32.mrf.mxu2 }
 0x342   :  { %v308_v37 = vmul.f32 5.656854, %v305_v44  ;;  %v667_v44 = vld [vmem:[#allocation5 + $0x18] sm:$0xff] }
 0x344   :  { %v309_v46 = vsel %vm249_vm5, %v308_v37, -1e+30  ;;  %v664_v37 = vld [vmem:[#allocation5] sm:$0xff] }
 0x345   :  { %v311_v47 = vsel %vm310_vm6, %v309_v46, -inf }
 0x387   :  { %v507_v43 = vpop.f32.mrf.mxu0 }
 0x388   :  { %v510_v42 = vmul.f32 5.656854, %v507_v43  ;;  %v669_v43 = vld [vmem:[#allocation5 + $0x28] sm:$0xff] }
 0x389   :  { %690 = vmatpush.msrb.mxu3 %v669_v43  ;;  %v756_v43 = vld [vmem:[#allocation7 + $0x38] sm:$0xff] }
 0x38a   :  { %v511_v45 = vsel %vm249_vm5, %v510_v42, -1e+30  ;;  %v668_v42 = vld [vmem:[#allocation5 + $0x20] sm:$0xff] }
 0x38b   :  { %v512_v33 = vsel %vm310_vm6, %v511_v45, -inf  ;;  %691 = vmatpush.msrb.mxu3 %v668_v42  ;;  %v753_v42 = vld [vmem:[#allocation7 + $0x20] sm:$0xff] }
 0x38c   :  { %513 = vmax.xlane.f32.xlu2 %v512_v33  ;;  %v665_v33 = vld [vmem:[#allocation5 + $0x8] sm:$0xff] }
 0x38d   :  { %692 = vmatpush.msrb.mxu3 %v667_v44  ;;  %v754_v44 = vld [vmem:[#allocation7 + $0x28] sm:$0xff] }
 0x394   :  { %312 = vmax.xlane.f32.xlu2 %v311_v47 }
 0x39d   :  { %v404_v48 = vpop.f32.mrf.mxu2 }
 0x39e   :  { %v407_v49 = vmul.f32 5.656854, %v404_v48 }
 0x3a0   :  { %v408_v50 = vsel %vm249_vm5, %v407_v49, -1e+30 }
 0x3a1   :  { %v409_v51 = vsel %vm310_vm6, %v408_v50, -inf }
 0x3a2   :  { %410 = vmax.xlane.f32.xlu0 %v409_v51 }
 0x3a5   :  { %v608_v52 = vpop.f32.mrf.mxu3 }
 0x3a6   :  { %v611_v53 = vmul.f32 5.656854, %v608_v52 }
 0x3a8   :  { %v612_v54 = vsel %vm249_vm5, %v611_v53, -1e+30 }
 0x3a9   :  { %v613_v55 = vsel %vm310_vm6, %v612_v54, -inf }
 0x3aa   :  { %614 = vmax.xlane.f32.xlu1 %v613_v55 }
 0x3ff   :  { %v514_v56 = vpop.xlane.xlu2 %513 }
 0x400   :  { %v515_v57 = vsub.f32 %v511_v45, %v514_v56  ;;  %v666_v45 = vld [vmem:[#allocation5 + $0x10] sm:$0xff] }
 0x401   :  { %693 = vmatpush.msrb.mxu3 %v666_v45  ;;  %v751_v45 = vld [vmem:[#allocation7 + $0x10] sm:$0xff] }
 0x402   :  { %v516_v58 = vmul.f32 1.442695, %v515_v57 }
 0x403   :  { %694 = vmatpush.msrb.mxu3 %v665_v33  ;;  %v752_v33 = vld [vmem:[#allocation7 + $0x18] sm:$0xff] }
 0x404   :  { %1054 = vpow2.f32 %v516_v58 }
 0x405   :  { %695 = vmatpush.msrb.mxu3 %v664_v37  ;;  %v749_v37 = vld [vmem:[#allocation7] sm:$0xff] }
 0x407   :  { %v313_v1 = vpop.xlane.xlu2 %312 }
 0x408   :  { %v314_v6 = vsub.f32 %v309_v46, %v313_v1  ;;  %v701_v46 = vmul.f32 %v1310_v32, %v1310_v32  ;;  %v776_v1 = vld [vmem:[#allocation7 + $0xd8] sm:$0xff] }
 0x40a   :  { %v1055_v59 = vpop.eup %1054  ;;  %v315_v9 = vmul.f32 1.442695, %v314_v6  ;;  %v774_v6 = vld [vmem:[#allocation7 + $0xc8] sm:$0xff] }
 0x40b   :  { %v518_v60 = vsel %vm310_vm6, %v1055_v59, 0.0 }
 0x40c   :  { %519 = vadd.xlane.f32.xlu1 %v518_v60  ;;  %v780_v60 = vld [vmem:[#allocation7 + $0xf8] sm:$0xff] }
 0x40d   :  { %801 = vmatpush.msra.mxu0 %v780_v60  ;;  %v884_v60 = vld [vmem:[#allocation8 + $0x78] sm:$0xff] }
 0x415   :  { %v411_v61 = vpop.xlane.xlu0 %410 }
 0x416   :  { %v412_v62 = vsub.f32 %v408_v50, %v411_v61  ;;  %v777_v61 = vld [vmem:[#allocation7 + $0xe0] sm:$0xff] }
 0x418   :  { %v413_v0 = vmul.f32 1.442695, %v412_v62  ;;  %v778_v62 = vld [vmem:[#allocation7 + $0xe8] sm:$0xff] }
 0x419   :  { %802 = vmatpush.msra.mxu0 %v778_v62  ;;  %v883_v62 = vld [vmem:[#allocation8 + $0x70] sm:$0xff] }
 0x41a   :  { %1056 = vpow2.f32 %v413_v0  ;;  %v775_v0 = vld [vmem:[#allocation7 + $0xd0] sm:$0xff] }
 0x41b   :  { %803 = vmatpush.msra.mxu0 %v776_v1  ;;  %v882_v1 = vld [vmem:[#allocation8 + $0x68] sm:$0xff] }
 0x41d   :  { %v615_v2 = vpop.xlane.xlu1 %614  ;;  %804 = vmatpush.msra.mxu0 %v774_v6  ;;  %v880_v6 = vld [vmem:[#allocation8 + $0x58] sm:$0xff] }
 0x41e   :  { %v616_v3 = vsub.f32 %v612_v54, %v615_v2 }
 0x420   :  { %v1057_v4 = vpop.eup %1056  ;;  %v617_v7 = vmul.f32 1.442695, %v616_v3 }
 0x421   :  { %v415_v8 = vsel %vm310_vm6, %v1057_v4, 0.0 }
 0x422   :  { %1058 = vpow2.f32 %v617_v7  ;;  %416 = vadd.xlane.f32.xlu0 %v415_v8  ;;  %v771_v7 = vld [vmem:[#allocation7 + $0xb0] sm:$0xff]  ;;  %v772_v8 = vld [vmem:[#allocation7 + $0xb8] sm:$0xff] }
 0x423   :  { %1060 = vpow2.f32 %v315_v9  ;;  %805 = vmatpush.msra.mxu0 %v772_v8  ;;  %v879_v8 = vld [vmem:[#allocation8 + $0x50] sm:$0xff] }
 0x425   :  { %523 = vrot.lane.b32.xlu1 %v1316_v34, %s1229_s24 }
 0x428   :  { %v1059_v10 = vpop.eup %1058 }
 0x429   :  { %v619_v11 = vsel %vm310_vm6, %v1059_v10, 0.0  ;;  %v1061_v12 = vpop.eup %1060 }
 0x42a   :  { %620 = vadd.xlane.f32.xlu2 %v619_v11  ;;  %v317_v13 = vsel %vm310_vm6, %v1061_v12, 0.0  ;;  %v770_v11 = vld [vmem:[#allocation7 + $0xa8] sm:$0xff] }
 0x42b   :  { %806 = vmatpush.msra.mxu0 %v770_v11  ;;  %v891_v11 = vld [vmem:[#allocation8 + $0xb0] sm:$0xff] }
 0x432   :  { %318 = vadd.xlane.f32.xlu2 %v317_v13 }
 0x436   :  { %322 = vrot.lane.b32.xlu0 %v1316_v34, %s1230_s25 }
 0x44f   :  { %702 = vadd.xlane.f32.xlu1 %v701_v46  ;;  %v750_v46 = vld [vmem:[#allocation7 + $0x8] sm:$0xff] }
 0x47f   :  { %v520_v16 = vpop.xlane.xlu1 %519 }
 0x495   :  { %v417_v14 = vpop.xlane.xlu0 %416 }
 0x496   :  { %1062 = vrcp.f32 %v417_v14 }
 0x497   :  { %v524_v20 = vpop.permute.xlu1 %523 }
 0x49c   :  { %v1063_v17 = vpop.eup %1062 }
 0x49d   :  { %v621_v15 = vpop.xlane.xlu2 %620  ;;  %v419_v19 = vmul.f32 %v1063_v17, %v1057_v4  ;;  %v773_v4 = vld [vmem:[#allocation7 + $0xc0] sm:$0xff] }
 0x4a5   :  { %v319_v18 = vpop.xlane.xlu2 %318 }
 0x4a6   :  { %1064 = vrcp.f32 %v319_v18 }
 0x4a7   :  { %1066 = vrcp.f32 %v520_v16 }
 0x4a8   :  { %v323_v63 = vpop.permute.xlu0 %322  ;;  %1068 = vrcp.f32 %v621_v15 }
 0x4a9   :  { %343 = vmatpush.msrb.mxu1 %v323_v63  ;;  %438 = vmatpush.msra.mxu2 %v323_v63 }
 0x4aa   :  { %1015 = vmatmul.msk.f32.vlgmr.msra.gmra.mxu2 %vm310_vm6, %v419_v19 }
 0x4ab   :  { %544 = vmatpush.msrb.mxu2 %v524_v20  ;;  %901 = vmatpush.msra.mxu1 %v884_v60 }
 0x4ac   :  { %v1065_v21 = vpop.eup %1064 }
 0x4ad   :  { %642 = vmatpush.msra.mxu2 %v524_v20  ;;  %v1067_v22 = vpop.eup %1066  ;;  %v321_v34 = vmul.f32 %v1065_v21, %v1061_v12  ;;  %902 = vmatpush.msra.mxu1 %v883_v62 }
 0x4ae   :  { %v522_v24 = vmul.f32 %v1067_v22, %v1055_v59  ;;  %v1069_v25 = vpop.eup %1068  ;;  %v779_v59 = vld [vmem:[#allocation7 + $0xf0] sm:$0xff] }
 0x4af   :  { %1012 = vmatmul.msk.f32.vlgmr.msrb.gmra.mxu1 %vm310_vm6, %v321_v34  ;;  %v623_v26 = vmul.f32 %v1069_v25, %v1059_v10  ;;  %v769_v10 = vld [vmem:[#allocation7 + $0xa0] sm:$0xff] }
 0x4b0   :  { %v1040_v34 = vld [vmem:[%s1489_s9] ss:$0 sm:$0xff]  ;;  %903 = vmatpush.msra.mxu1 %v882_v1 }
 0x4b2   :  { %1018 = vmatmul.msk.f32.vlgmr.msrb.gmra.mxu2 %vm310_vm6, %v522_v24 }
 0x4b3   :  { %781 = vmatpush.msrb.mxu2 %v779_v59  ;;  %v898_v59 = vld [vmem:[#allocation8 + $0xe8] sm:$0xff] }
 0x4b5   :  { %782 = vmatpush.msrb.mxu2 %v777_v61  ;;  %v897_v61 = vld [vmem:[#allocation8 + $0xe0] sm:$0xff] }
 0x4b7   :  { %783 = vmatpush.msrb.mxu2 %v775_v0  ;;  %v896_v0 = vld [vmem:[#allocation8 + $0xd8] sm:$0xff] }
 0x4b9   :  { %784 = vmatpush.msrb.mxu2 %v773_v4  ;;  %v894_v4 = vld [vmem:[#allocation8 + $0xc8] sm:$0xff] }
 0x4ba   :  { %1021 = vmatmul.msk.f32.vlgmr.msra.gmra.mxu2 %vm310_vm6, %v623_v26 }
 0x4bb   :  { %785 = vmatpush.msrb.mxu2 %v771_v7  ;;  %v893_v7 = vld [vmem:[#allocation8 + $0xc0] sm:$0xff] }
 0x4bd   :  { %786 = vmatpush.msrb.mxu2 %v769_v10  ;;  %v878_v10 = vld [vmem:[#allocation8 + $0x48] sm:$0xff] }
 0x4c2   :  { %v703_v56 = vpop.xlane.xlu1 %702 }
 0x4c3   :  { %1070 = vrsqrt.f32 %v703_v56 }
 0x4c9   :  { %v1071_v57 = vpop.eup %1070 }
 0x4ca   :  { %v705_v58 = vmul.f32 %v1071_v57, %v703_v56  ;;  %vm711_vm9 = vweird.f32 %v1071_v57 }
 0x4cc   :  { %v706_v2 = vmul.f32 %v1071_v57, %v705_v58  ;;  %v899_v58 = vld [vmem:[#allocation8 + $0xf0] sm:$0xff] }
 0x4ce   :  { %v707_v9 = vmul.f32 0.5, %v706_v2  ;;  %v895_v2 = vld [vmem:[#allocation8 + $0xd0] sm:$0xff] }
 0x4d0   :  { %v708_v13 = vsub.f32 1.5, %v707_v9  ;;  %v892_v9 = vld [vmem:[#allocation8 + $0xb8] sm:$0xff] }
 0x4d2   :  { %v709_v16 = vmul.f32 %v1071_v57, %v708_v13  ;;  %v890_v13 = vld [vmem:[#allocation8 + $0xa8] sm:$0xff] }
 0x52c   :  { %v345_v49 = vpop.f32.mrf.mxu1 }
 0x52d   :  { %v440_v27 = vpop.f32.mrf.mxu2 }
 0x52e   :  { %648 = vrot.lane.b32.xlu2 %v440_v27, %s1229_s24 }
 0x535   :  { %v546_v28 = vpop.f32.mrf.mxu2 }
 0x536   :  { %652 = vrot.lane.b32.xlu0 %v546_v28, %s1230_s25  ;;  %v767_v28 = vld [vmem:[#allocation7 + $0x90] sm:$0xff] }
 0x537   :  { %787 = vmatpush.msrb.mxu2 %v767_v28 }
 0x539   :  { %788 = vmatpush.msrb.mxu2 %v765_v29  ;;  %v870_v29 = vld [vmem:[#allocation8 + $0x8] sm:$0xff] }
 0x53b   :  { %789 = vmatpush.msrb.mxu2 %v763_v35 }
 0x53d   :  { %v644_v5 = vpop.f32.mrf.mxu2 }
 0x53e   :  { %656 = vrot.lane.b32.xlu0 %v644_v5, %s1231_s26  ;;  %v768_v5 = vld [vmem:[#allocation7 + $0x98] sm:$0xff] }
 0x53f   :  { %807 = vmatpush.msra.mxu0 %v768_v5 }
 0x541   :  { %808 = vmatpush.msra.mxu0 %v766_v30  ;;  %v869_v30 = vld [vmem:[#allocation8] sm:$0xff] }
 0x543   :  { %809 = vmatpush.msra.mxu0 %v764_v36 }
 0x545   :  { %810 = vmatpush.msra.mxu0 %v762_v23 }
 0x547   :  { %811 = vmatpush.msra.mxu0 %v760_v39 }
 0x549   :  { %812 = vmatpush.msra.mxu0 %v758_v41 }
 0x54b   :  { %813 = vmatpush.msra.mxu0 %v756_v43 }
 0x54d   :  { %814 = vmatpush.msra.mxu0 %v754_v44 }
 0x54f   :  { %815 = vmatpush.msra.mxu0 %v752_v33 }
 0x551   :  { %816 = vmatpush.msra.mxu0 %v750_v46 }
 0x588   :  { %v649_v48 = vpop.permute.xlu2 %648 }
 0x589   :  { %v659_v50 = vsel %vm193_vm1, %v345_v49, %v649_v48  ;;  %vm710_vm1 = vweird.f32 %v703_v56 }
 0x58a   :  { %vm712_vm10 = vmor %vm710_vm1, %vm711_vm9 }
 0x58b   :  { %v713_v63 = vsel %vm712_vm10, %v1071_v57, %v709_v16  ;;  %v900_v57 = vld [vmem:[#allocation8 + $0xf8] sm:$0xff]  ;;  %v821_v16 = vld [vmem:[%s1488_s8] sm:$0x3] }
 0x58c   :  { %v714_v22 = vmul.f32 %v713_v63, %v1310_v32  ;;  %v761_v32 = vld [vmem:[#allocation7 + $0x60] sm:$0xff]  ;;  %921 = vmatpush.msra.mxu3 %v900_v57  ;;  %v887_v63 = vld [vmem:[#allocation8 + $0x90] sm:$0xff]  ;;  %v823_v5 = vperm.slane %v821_v16, 0 }
 0x58d   :  { %790 = vmatpush.msrb.mxu2 %v761_v32 }
 0x58e   :  { %922 = vmatpush.msra.mxu3 %v899_v58 }
 0x58f   :  { %791 = vmatpush.msrb.mxu2 %v759_v38 }
 0x590   :  { %923 = vmatpush.msra.mxu3 %v898_v59 }
 0x591   :  { %792 = vmatpush.msrb.mxu2 %v757_v40 }
 0x592   :  { %924 = vmatpush.msra.mxu3 %v897_v61 }
 0x593   :  { %793 = vmatpush.msrb.mxu2 %v755_v31 }
 0x594   :  { %925 = vmatpush.msra.mxu3 %v896_v0 }
 0x595   :  { %794 = vmatpush.msrb.mxu2 %v753_v42 }
 0x596   :  { %926 = vmatpush.msra.mxu3 %v895_v2 }
 0x597   :  { %795 = vmatpush.msrb.mxu2 %v751_v45 }
 0x598   :  { %927 = vmatpush.msra.mxu3 %v894_v4 }
 0x599   :  { %796 = vmatpush.msrb.mxu2 %v749_v37 }
 0x59a   :  { %928 = vmatpush.msra.mxu3 %v893_v7 }
 0x59c   :  { %929 = vmatpush.msra.mxu3 %v892_v9 }
 0x59e   :  { %930 = vmatpush.msra.mxu3 %v891_v11 }
 0x5a0   :  { %931 = vmatpush.msra.mxu3 %v890_v13 }
 0x5a8   :  { %v653_v47 = vpop.permute.xlu0 %652 }
 0x5a9   :  { %v661_v51 = vsel %vm660_vm7, %v659_v50, %v653_v47 }
 0x5b0   :  { %v657_v52 = vpop.permute.xlu0 %656 }
 0x5b1   :  { %v663_v53 = vsel %vm662_vm8, %v661_v51, %v657_v52 }
 0x5b2   :  { %696 = vmatmul.f32.vlgmr.msrb.gmra.mxu3 %v663_v53 }
 0x635   :  { %v697_v54 = vpop.f32.mrf.mxu3 }
 0x636   :  { %v715_v55 = vmul.f32 %v697_v54, %v697_v54 }
 0x638   :  { %716 = vadd.xlane.f32.xlu0 %v715_v55 }
 0x6ab   :  { %v717_v3 = vpop.xlane.xlu0 %716 }
 0x6ac   :  { %1072 = vrsqrt.f32 %v717_v3  ;;  %vm724_vm12 = vweird.f32 %v717_v3 }
 0x6b2   :  { %v1073_v12 = vpop.eup %1072 }
 0x6b3   :  { %v719_v14 = vmul.f32 %v1073_v12, %v717_v3  ;;  %vm725_vm11 = vweird.f32 %v1073_v12  ;;  %v881_v3 = vld [vmem:[#allocation8 + $0x60] sm:$0xff] }
 0x6b4   :  { %vm726_vm13 = vmor %vm724_vm12, %vm725_vm11  ;;  %904 = vmatpush.msra.mxu1 %v881_v3 }
 0x6b5   :  { %v720_v15 = vmul.f32 %v1073_v12, %v719_v14  ;;  %v876_v14 = vld [vmem:[#allocation8 + $0x38] sm:$0xff] }
 0x6b6   :  { %905 = vmatpush.msra.mxu1 %v880_v6 }
 0x6b7   :  { %v721_v17 = vmul.f32 0.5, %v720_v15  ;;  %v889_v15 = vld [vmem:[#allocation8 + $0xa0] sm:$0xff] }
 0x6b8   :  { %906 = vmatpush.msra.mxu1 %v879_v8  ;;  %932 = vmatpush.msra.mxu3 %v889_v15 }
 0x6b9   :  { %v722_v18 = vsub.f32 1.5, %v721_v17  ;;  %v875_v17 = vld [vmem:[#allocation8 + $0x30] sm:$0xff] }
 0x6ba   :  { %907 = vmatpush.msra.mxu1 %v878_v10 }
 0x6bb   :  { %v723_v19 = vmul.f32 %v1073_v12, %v722_v18  ;;  %v888_v18 = vld [vmem:[#allocation8 + $0x98] sm:$0xff] }
 0x6bc   :  { %933 = vmatpush.msra.mxu3 %v888_v18 }
 0x6bd   :  { %v727_v20 = vsel %vm726_vm13, %v1073_v12, %v723_v19  ;;  %v877_v12 = vld [vmem:[#allocation8 + $0x40] sm:$0xff]  ;;  %v874_v19 = vld [vmem:[#allocation8 + $0x28] sm:$0xff] }
 0x6be   :  { %v728_v21 = vmul.f32 %v727_v20, %v697_v54  ;;  %908 = vmatpush.msra.mxu1 %v877_v12  ;;  %v824_v20 = vperm.slane %v821_v16, 1  ;;  %934 = vmatpush.msra.mxu3 %v887_v63 }
 0x6c0   :  { %v729_v24 = vsub.f32 %v728_v21, %v714_v22  ;;  %909 = vmatpush.msra.mxu1 %v876_v14  ;;  %v873_v21 = vld [vmem:[#allocation8 + $0x20] sm:$0xff] }
 0x6c2   :  { %v733_v25 = vmul.f32 %v1040_v34, %v729_v24  ;;  %910 = vmatpush.msra.mxu1 %v875_v17  ;;  %v872_v24 = vld [vmem:[#allocation8 + $0x18] sm:$0xff] }
 0x6c4   :  { %v734_v26 = vadd.f32 %v733_v25, %v714_v22  ;;  %911 = vmatpush.msra.mxu1 %v874_v19  ;;  %v886_v22 = vld [vmem:[#allocation8 + $0x88] sm:$0xff]  ;;  %v885_v25 = vld [vmem:[#allocation8 + $0x80] sm:$0xff] }
 0x6c5   :  { %935 = vmatpush.msra.mxu3 %v886_v22 }
 0x6c6   :  { %v735_v27 = vmul.f32 %v734_v26, %v734_v26  ;;  %912 = vmatpush.msra.mxu1 %v873_v21 }
 0x6c7   :  { %936 = vmatpush.msra.mxu3 %v885_v25 }
 0x6c8   :  { %736 = vadd.xlane.f32.xlu2 %v735_v27  ;;  %913 = vmatpush.msra.mxu1 %v872_v24  ;;  %v871_v27 = vld [vmem:[#allocation8 + $0x10] sm:$0xff] }
 0x6ca   :  { %914 = vmatpush.msra.mxu1 %v871_v27 }
 0x6cc   :  { %915 = vmatpush.msra.mxu1 %v870_v29 }
 0x6ce   :  { %916 = vmatpush.msra.mxu1 %v869_v30 }
 0x73b   :  { %v737_v47 = vpop.xlane.xlu2 %736 }
 0x73c   :  { %1074 = vrsqrt.f32 %v737_v47  ;;  %vm744_vm15 = vweird.f32 %v737_v47 }
 0x742   :  { %v1075_v48 = vpop.eup %1074 }
 0x743   :  { %v739_v49 = vmul.f32 %v1075_v48, %v737_v47  ;;  %vm745_vm14 = vweird.f32 %v1075_v48 }
 0x744   :  { %vm746_vm0 = vmor %vm744_vm15, %vm745_vm14 }
 0x745   :  { %v740_v50 = vmul.f32 %v1075_v48, %v739_v49 }
 0x747   :  { %v741_v51 = vmul.f32 0.5, %v740_v50 }
 0x749   :  { %v742_v52 = vsub.f32 1.5, %v741_v51 }
 0x74b   :  { %v743_v53 = vmul.f32 %v1075_v48, %v742_v52 }
 0x74d   :  { %v747_v54 = vsel %vm746_vm0, %v1075_v48, %v743_v53 }
 0x74e   :  { %v1464_v55 = vmul.f32 %v747_v54, %v734_v26 }
 0x750   :  { %797 = vmatmul.f32.vlgmr.msrb.gmra.mxu2 %v1464_v55  ;;  %817 = vmatmul.f32.vlgmr.msra.gmra.mxu0 %v1464_v55  ;;  %v942_v56 = vmul.f32 %v1464_v55, %v1464_v55 }
 0x752   :  { %943 = vadd.xlane.f32.xlu1 %v942_v56 }
 0x7c5   :  { %v944_v2 = vpop.xlane.xlu1 %943 }
 0x7c6   :  { %vm951_vm10 = vweird.f32 %v944_v2 }
 0x7cd   :  { %v818_v34 = vpop.f32.mrf.mxu0 }
 0x7ce   :  { %v828_v26 = vmul.f32 %v824_v20, %v818_v34  ;;  %v1041_v20 = vld [vmem:[%s1490_s10] ss:$0 sm:$0xff]  ;;  %s998_s10 = sshll.u32 %s1491_s11, 4  ;;  %s999_s10 = int_to_ptr.hbm [resolvable:$true] %s998_s10 }
 0x7d0   :  { %v1023_v28 = vmul.f32 -1.442695, %v828_v26 }
 0x7d2   :  { %1076 = vpow2.f32 %v1023_v28 }
 0x7d3   :  { %v798_v35 = vpop.f32.mrf.mxu2 }
 0x7d4   :  { %v827_v36 = vmul.f32 %v823_v5, %v798_v35 }
 0x7d6   :  { %v1022_v32 = vmul.f32 -1.442695, %v827_v36 }
 0x7d8   :  { %v1077_v23 = vpop.eup %1076  ;;  %1078 = vpow2.f32 %v1022_v32 }
 0x7d9   :  { %v836_v38 = vadd.f32 1.0, %v1077_v23 }
 0x7db   :  { %1080 = vrcp.f32 %v836_v38  ;;  %v863_v42 = vand.u32 2147483648, %v836_v38  ;;  %v861_v45 = vand.u32 2147483647, %v836_v38  ;;  %vm857_vm3 = vweird.f32 %v836_v38 }
 0x7dd   :  { %v864_v47 = vor.u32 1.1754944e-38, %v863_v42  ;;  %vm862_vm5 = vcmp.eq.f32.partialorder %v861_v45, 8.507059e+37 }
 0x7de   :  { %v1079_v39 = vpop.eup %1078 }
 0x7df   :  { %v835_v40 = vadd.f32 1.0, %v1079_v39 }
 0x7e1   :  { %v1081_v41 = vpop.eup %1080  ;;  %1082 = vrcp.f32 %v835_v40  ;;  %v848_v51 = vand.u32 2147483648, %v835_v40  ;;  %v846_v54 = vand.u32 2147483647, %v835_v40  ;;  %vm842_vm7 = vweird.f32 %v835_v40 }
 0x7e2   :  { %v853_v31 = vmul.f32 %v1081_v41, %v836_v38  ;;  %vm858_vm2 = vweird.f32 %v1081_v41  ;;  %1084 = vrsqrt.f32 %v944_v2 }
 0x7e3   :  { %vm859_vm4 = vmor %vm857_vm3, %vm858_vm2  ;;  %v849_v57 = vor.u32 1.1754944e-38, %v848_v51  ;;  %vm847_vm1 = vcmp.eq.f32.partialorder %v846_v54, 8.507059e+37 }
 0x7e4   :  { %v854_v43 = vsub.f32 1.0, %v853_v31 }
 0x7e6   :  { %v855_v44 = vmul.f32 %v1081_v41, %v854_v43 }
 0x7e7   :  { %v1083_v33 = vpop.eup %1082 }
 0x7e8   :  { %v856_v37 = vadd.f32 %v1081_v41, %v855_v44  ;;  %v838_v46 = vmul.f32 %v1083_v33, %v835_v40  ;;  %vm843_vm6 = vweird.f32 %v1083_v33  ;;  %v1085_v3 = vpop.eup %1084 }
 0x7e9   :  { %vm844_vm8 = vmor %vm842_vm7, %vm843_vm6  ;;  %v946_v4 = vmul.f32 %v1085_v3, %v944_v2  ;;  %vm952_vm9 = vweird.f32 %v1085_v3 }
 0x7ea   :  { %v860_v48 = vsel %vm859_vm4, %v1081_v41, %v856_v37  ;;  %v839_v49 = vsub.f32 1.0, %v838_v46  ;;  %vm953_vm12 = vmor %vm951_vm10, %vm952_vm9 }
 0x7eb   :  { %v865_v50 = vsel %vm862_vm5, %v864_v47, %v860_v48  ;;  %v947_v6 = vmul.f32 %v1085_v3, %v946_v4 }
 0x7ec   :  { %v868_v52 = vmul.f32 %v865_v50, %v828_v26  ;;  %v840_v53 = vmul.f32 %v1083_v33, %v839_v49 }
 0x7ed   :  { %v948_v8 = vmul.f32 0.5, %v947_v6 }
 0x7ee   :  { %v841_v56 = vadd.f32 %v1083_v33, %v840_v53  ;;  %937 = vmatmul.f32.vlgmr.msra.gmra.mxu3 %v868_v52 }
 0x7ef   :  { %v949_v10 = vsub.f32 1.5, %v948_v8 }
 0x7f0   :  { %v845_v58 = vsel %vm844_vm8, %v1083_v33, %v841_v56 }
 0x7f1   :  { %v850_v59 = vsel %vm847_vm1, %v849_v57, %v845_v58  ;;  %v950_v13 = vmul.f32 %v1085_v3, %v949_v10 }
 0x7f2   :  { %v867_v60 = vmul.f32 %v850_v59, %v827_v36 }
 0x7f3   :  { %v954_v17 = vsel %vm953_vm12, %v1085_v3, %v950_v13 }
 0x7f4   :  { %917 = vmatmul.f32.vlgmr.msra.gmra.mxu1 %v867_v60  ;;  %v955_v63 = vmul.f32 %v954_v17, %v1464_v55 }
 0x871   :  { %v918_v61 = vpop.f32.mrf.mxu1  ;;  %v938_v62 = vpop.f32.mrf.mxu3 }
 0x872   :  { %v939_v0 = vadd.f32 %v938_v62, %v918_v61 }
 0x874   :  { %v956_v1 = vmul.f32 %v939_v0, %v939_v0 }
 0x876   :  { %957 = vadd.xlane.f32.xlu0 %v956_v1 }
 0x8e9   :  { %v958_v7 = vpop.xlane.xlu0 %957 }
 0x8ea   :  { %1086 = vrsqrt.f32 %v958_v7  ;;  %vm965_vm13 = vweird.f32 %v958_v7 }
 0x8f0   :  { %v1087_v9 = vpop.eup %1086 }
 0x8f1   :  { %v960_v11 = vmul.f32 %v1087_v9, %v958_v7  ;;  %vm966_vm11 = vweird.f32 %v1087_v9 }
 0x8f2   :  { %vm967_vm14 = vmor %vm965_vm13, %vm966_vm11 }
 0x8f3   :  { %v961_v12 = vmul.f32 %v1087_v9, %v960_v11 }
 0x8f5   :  { %v962_v14 = vmul.f32 0.5, %v961_v12 }
 0x8f7   :  { %v963_v15 = vsub.f32 1.5, %v962_v14 }
 0x8f9   :  { %v964_v16 = vmul.f32 %v1087_v9, %v963_v15 }
 0x8fb   :  { %v968_v18 = vsel %vm967_vm14, %v1087_v9, %v964_v16 }
 0x8fc   :  { %v969_v19 = vmul.f32 %v968_v18, %v939_v0 }
 0x8fe   :  { %v970_v21 = vsub.f32 %v969_v19, %v955_v63 }
 0x900   :  { %v974_v22 = vmul.f32 %v1041_v20, %v970_v21 }
 0x902   :  { %v975_v34 = vadd.f32 %v974_v22, %v955_v63 }
 0x904   :  { %v976_v24 = vmul.f32 %v975_v34, %v975_v34 }
 0x906   :  { %977 = vadd.xlane.f32.xlu1 %v976_v24 }
 0x979   :  { %v978_v25 = vpop.xlane.xlu1 %977 }
 0x97a   :  { %1088 = vrsqrt.f32 %v978_v25  ;;  %vm985_vm0 = vweird.f32 %v978_v25 }
 0x980   :  { %v1089_v26 = vpop.eup %1088 }
 0x981   :  { %v980_v27 = vmul.f32 %v1089_v26, %v978_v25  ;;  %vm986_vm15 = vweird.f32 %v1089_v26 }
 0x982   :  { %vm987_vm2 = vmor %vm985_vm0, %vm986_vm15 }
 0x983   :  { %v981_v28 = vmul.f32 %v1089_v26, %v980_v27 }
 0x985   :  { %v982_v5 = vmul.f32 0.5, %v981_v28 }
 0x987   :  { %v983_v29 = vsub.f32 1.5, %v982_v5 }
 0x989   :  { %v984_v30 = vmul.f32 %v1089_v26, %v983_v29 }
 0x98b   :  { %v988_v55 = vsel %vm987_vm2, %v1089_v26, %v984_v30 }
 0x98c   :  { %v989_v35 = vmul.f32 %v988_v55, %v975_v34 }
 0x98e   :  { %990 = vst [vmem:[#allocation10] sm:$0xff] %v989_v35 }
 0x98f   :  { %1001 = dma.vmem_to_hbm [thread:$0]  %s997_s13, 128, %s999_s10, [#allocation4]  }
 0x990   :  { %1216 = dma.done.wait [#allocation4], 128  }
 0x991   :  { %1217 = vsyncadd [#allocation4], 4294967168 }
 0x992   :  { %1006 = vsyncpa [#allocation3], 1 }
 0x993   :  { %1007 = vsyncpa [#allocation6], 1 }
 0x994   :  { %1008 = vsyncpa [#allocation9], 1 }
 0x995   :  { %1009 = vsyncpa [#allocation4], 1 }

</bundles_post_ra>
